<compile_context>
chip_gen: v5e
topology: v5e:2x2
jax: 0.10.0
libtpu: 0.0.40
codegen_flags: <defaults>
</compile_context>

<pallas_src>
import functools

import jax
import jax.numpy as jnp
from jax import lax
from jax.experimental import pallas as pl
from jax.experimental.pallas import tpu as pltpu

FEAT = 576          # MobileNetV3-small feature width
FEAT_PAD = 640      # 5 * 128 lanes (zero-padded tail, numerically exact)
HIDDEN = 1024
LANE = 128
PACK = 128          # lane-dense packed head output width
MAX_TILE_S = 2048   # spatial rows per backbone grid step


def _round_up(x, m):
    return (x + m - 1) // m * m


def _cdiv(a, b):
    return -(-a // b)


def _hswish(x):
    return x * jnp.clip(x + 3.0, 0.0, 6.0) * (1.0 / 6.0)


# --------------------- fused backbone (stem + proj + GAP) ------------------ #
# One grid step = one (batch, spatial-tile).  Actor and critic trunks share
# the patch stream inside the body (stacked stem N, block-diagonal proj).

def _backbone_kernel(patches_ref, stem_w_ref, stem_b_ref, proj_w_ref,
                     pooled_ref, acc_ref, *, s_true, tile_s, n_tiles):
    s = pl.program_id(1)

    @pl.when(s == 0)
    def _init():
        acc_ref[...] = jnp.zeros_like(acc_ref)

    x = patches_ref[0]                                      # (tile_s, kkcp) bf16
    # stem conv (im2col matmul, BN folded) + hardswish, both nets at once
    h = jnp.dot(x, stem_w_ref[...], preferred_element_type=jnp.float32)
    h = _hswish(h + stem_b_ref[...])                        # (tile_s, 16*n) f32
    if tile_s * n_tiles != s_true:
        # mask padded spatial rows on the NARROW activation (hswish(0 @ W) == 0,
        # so the wide feature rows come out exactly zero).
        row = s * tile_s + lax.broadcasted_iota(jnp.int32, h.shape, 0)
        h = jnp.where(row < s_true, h, 0.0)
    # block-diagonal 1x1 projection to (padded) 576-dim features + hardswish
    f = _hswish(jnp.dot(h.astype(jnp.bfloat16), proj_w_ref[...],
                        preferred_element_type=jnp.float32))  # (tile_s, n*FEAT_PAD)
    # global-average-pool partial sum: one lane-dense (1, n*FEAT_PAD) row update
    acc_ref[...] = acc_ref[...] + jnp.sum(f, axis=0, keepdims=True)

    @pl.when(s == pl.num_programs(1) - 1)
    def _finalize():
        pooled_ref[0] = (acc_ref[...] * (1.0 / s_true)).astype(jnp.bfloat16)


def _backbone_vmem_limit(tile_s, kkcp, n16, nf):
    patch = 3 * tile_s * kkcp * 2                 # buffered patch tiles (bf16)
    act = 3 * tile_s * nf * 4 + 2 * tile_s * n16 * 4   # f / h transients (f32)
    wts = (kkcp * n16 + n16 * nf) * 2 + n16 * 4 + 4 * nf * 4
    est = patch + act + wts
    return int(min(32 << 20, max(12 << 20, 2 * est)))


def backbone_pooled(trunk, patches_bf16, s_true, tile_s, n_tiles):
    """Stem + 1x1 proj + GAP for 1 or 2 fused trunks in one pallas_call.

    Returns pooled features of shape (B, n_nets * FEAT_PAD) in bf16.
    """
    B, s_pad, kkcp = patches_bf16.shape
    n16 = trunk['stem_w'].shape[1]
    nf = trunk['proj_w'].shape[1]

    kernel = functools.partial(_backbone_kernel, s_true=s_true,
                               tile_s=tile_s, n_tiles=n_tiles)
    pooled = pl.pallas_call(
        kernel,
        out_shape=jax.ShapeDtypeStruct((B, 1, nf), jnp.bfloat16),
        grid=(B, n_tiles),
        in_specs=[
            pl.BlockSpec((1, tile_s, kkcp), lambda b, s: (b, s, 0)),
            pl.BlockSpec(trunk['stem_w'].shape, lambda b, s: (0, 0)),
            pl.BlockSpec(trunk['stem_b'].shape, lambda b, s: (0, 0)),
            pl.BlockSpec(trunk['proj_w'].shape, lambda b, s: (0, 0)),
        ],
        out_specs=pl.BlockSpec((1, 1, nf), lambda b, s: (b, 0, 0)),
        scratch_shapes=[pltpu.VMEM((1, nf), jnp.float32)],
        compiler_params=pltpu.CompilerParams(
            dimension_semantics=("parallel", "arbitrary"),
            vmem_limit_bytes=_backbone_vmem_limit(tile_s, kkcp, n16, nf)),
    )(patches_bf16, trunk['stem_w'], trunk['stem_b'], trunk['proj_w'])
    return pooled[:, 0, :]


# ------------------------------ fused heads -------------------------------- #
# Gridded over the batch (256-row tiles, "parallel") so they pipeline and use
# both TensorCores on v7x; weights ride along as constant-index blocks.

def _full_spec(arr):
    n = arr.ndim
    return pl.BlockSpec(arr.shape, lambda i, _n=n: (0,) * _n)


def _pad_rows(x, rows):
    return jnp.pad(x, ((0, rows - x.shape[0]),) + ((0, 0),) * (x.ndim - 1))


def _head_tiling(B):
    tile_b = min(_round_up(B, 8), 256)
    b_pad = _round_up(B, tile_b)
    return tile_b, b_pad


def _eval_head_kernel(pooled_ref, act_ref,
                      w1a_ref, b1a_ref, w2a_ref, b2a_ref,
                      w1c_ref, b1c_ref, w2c_ref, b2c_ref,
                      out_ref, *, action_dim):
    pa = pooled_ref[:, :FEAT_PAD]                           # (tb, 640) bf16
    pc = pooled_ref[:, FEAT_PAD:]
    # actor: Linear + Hardswish + Linear + softmax / log_prob / entropy
    ha = _hswish(jnp.dot(pa, w1a_ref[...],
                         preferred_element_type=jnp.float32) + b1a_ref[...])
    za = jnp.dot(ha.astype(jnp.bfloat16), w2a_ref[...],
                 preferred_element_type=jnp.float32) + b2a_ref[...]
    col = lax.broadcasted_iota(jnp.int32, za.shape, 1)
    valid = col < action_dim
    z = jnp.where(valid, za, -1e30)
    m = jnp.max(z, axis=-1, keepdims=True)
    e = jnp.where(valid, jnp.exp(z - m), 0.0)
    ssum = jnp.sum(e, axis=-1, keepdims=True)
    logp_full = (z - m) - jnp.log(ssum)
    onehot = (col == act_ref[...]).astype(jnp.float32)
    logp = jnp.sum(onehot * logp_full, axis=-1, keepdims=True)           # (tb,1)
    p = e / ssum                                                         # exact
    ent = -jnp.sum(jnp.where(valid, p * logp_full, 0.0),
                   axis=-1, keepdims=True)                               # (tb,1)
    # critic: Linear + Hardswish + Linear(1)
    hc = _hswish(jnp.dot(pc, w1c_ref[...],
                         preferred_element_type=jnp.float32) + b1c_ref[...])
    vc = jnp.dot(hc.astype(jnp.bfloat16), w2c_ref[...],
                 preferred_element_type=jnp.float32) + b2c_ref[...]
    value = vc[:, 0:1]                                                   # (tb,1)
    # pack [log_prob, entropy, value] into one lane-dense slab (cols 0,1,2)
    pcol = lax.broadcasted_iota(jnp.int32, out_ref.shape, 1)
    out_ref[...] = (jnp.where(pcol == 0, logp, 0.0)
                    + jnp.where(pcol == 1, ent, 0.0)
                    + jnp.where(pcol == 2, value, 0.0))


def eval_head(pooled_ac, actor_p, critic_p, action, action_dim):
    B = pooled_ac.shape[0]
    tile_b, b_pad = _head_tiling(B)
    pooled_ac = _pad_rows(pooled_ac, b_pad)
    act = _pad_rows(action.reshape(B, 1).astype(jnp.int32), b_pad)
    nf2 = pooled_ac.shape[1]
    weights = (actor_p['w1'], actor_p['b1'], actor_p['w2'], actor_p['b2'],
               critic_p['w1'], critic_p['b1'], critic_p['w2'], critic_p['b2'])
    kernel = functools.partial(_eval_head_kernel, action_dim=action_dim)
    out = pl.pallas_call(
        kernel,
        out_shape=jax.ShapeDtypeStruct((b_pad, PACK), jnp.float32),
        grid=(b_pad // tile_b,),
        in_specs=[pl.BlockSpec((tile_b, nf2), lambda i: (i, 0)),
                  pl.BlockSpec((tile_b, 1), lambda i: (i, 0))]
                 + [_full_spec(w) for w in weights],
        out_specs=pl.BlockSpec((tile_b, PACK), lambda i: (i, 0)),
        compiler_params=pltpu.CompilerParams(
            dimension_semantics=("parallel",),
            vmem_limit_bytes=32 * 1024 * 1024),
    )(pooled_ac, act, *weights)
    return out[:B]


def _dist_head_kernel(pooled_ref, w1_ref, b1_ref, w2_ref, b2_ref, out_ref,
                      *, action_dim):
    h = _hswish(jnp.dot(pooled_ref[...], w1_ref[...],
                        preferred_element_type=jnp.float32) + b1_ref[...])
    z = jnp.dot(h.astype(jnp.bfloat16), w2_ref[...],
                preferred_element_type=jnp.float32) + b2_ref[...]
    col = lax.broadcasted_iota(jnp.int32, z.shape, 1)
    valid = col < action_dim
    z = jnp.where(valid, z, -1e30)
    m = jnp.max(z, axis=-1, keepdims=True)
    e = jnp.where(valid, jnp.exp(z - m), 0.0)
    out_ref[...] = e / jnp.sum(e, axis=-1, keepdims=True)    # exact softmax


def dist_head(pooled_a, actor_p, action_dim):
    B = pooled_a.shape[0]
    tile_b, b_pad = _head_tiling(B)
    pooled_a = _pad_rows(pooled_a, b_pad)
    a_pad = actor_p['out_pad']
    weights = (actor_p['w1'], actor_p['b1'], actor_p['w2'], actor_p['b2'])
    kernel = functools.partial(_dist_head_kernel, action_dim=action_dim)
    out = pl.pallas_call(
        kernel,
        out_shape=jax.ShapeDtypeStruct((b_pad, a_pad), jnp.float32),
        grid=(b_pad // tile_b,),
        in_specs=[pl.BlockSpec((tile_b, FEAT_PAD), lambda i: (i, 0))]
                 + [_full_spec(w) for w in weights],
        out_specs=pl.BlockSpec((tile_b, a_pad), lambda i: (i, 0)),
        compiler_params=pltpu.CompilerParams(
            dimension_semantics=("parallel",),
            vmem_limit_bytes=32 * 1024 * 1024),
    )(pooled_a, *weights)
    return out[:B, :action_dim]


def _value_head_kernel(pooled_ref, w1_ref, b1_ref, w2_ref, b2_ref, out_ref):
    h = _hswish(jnp.dot(pooled_ref[...], w1_ref[...],
                        preferred_element_type=jnp.float32) + b1_ref[...])
    out_ref[...] = jnp.dot(h.astype(jnp.bfloat16), w2_ref[...],
                           preferred_element_type=jnp.float32) + b2_ref[...]


def value_head(pooled_c, critic_p):
    B = pooled_c.shape[0]
    tile_b, b_pad = _head_tiling(B)
    pooled_c = _pad_rows(pooled_c, b_pad)
    c_pad = critic_p['out_pad']
    weights = (critic_p['w1'], critic_p['b1'], critic_p['w2'], critic_p['b2'])
    out = pl.pallas_call(
        _value_head_kernel,
        out_shape=jax.ShapeDtypeStruct((b_pad, c_pad), jnp.float32),
        grid=(b_pad // tile_b,),
        in_specs=[pl.BlockSpec((tile_b, FEAT_PAD), lambda i: (i, 0))]
                 + [_full_spec(w) for w in weights],
        out_specs=pl.BlockSpec((tile_b, c_pad), lambda i: (i, 0)),
        compiler_params=pltpu.CompilerParams(
            dimension_semantics=("parallel",),
            vmem_limit_bytes=32 * 1024 * 1024),
    )(pooled_c, *weights)
    return out[:B, 0]


# ------------------------------- JAX glue ---------------------------------- #

def extract_patches(x_nhwc, k=3, s=2, p=1):
    """im2col for a 3x3 / stride-2 / pad-1 conv. Returns (B, Ho, Wo, k*k*C)."""
    B, H, W, C = x_nhwc.shape
    xp = jnp.pad(x_nhwc, ((0, 0), (p, p), (p, p), (0, 0)))
    Ho = (H + 2 * p - k) // s + 1
    Wo = (W + 2 * p - k) // s + 1
    parts = []
    for dh in range(k):
        for dw in range(k):
            parts.append(lax.slice(
                xp,
                (0, dh, dw, 0),
                (B, dh + s * (Ho - 1) + 1, dw + s * (Wo - 1) + 1, C),
                (1, s, s, 1)))
    return jnp.concatenate(parts, axis=-1), Ho, Wo   # flatten order: (kh, kw, cin)


def prepare_patches(state_nchw):
    """NCHW f32 -> (B, Sp, KKCp) bf16 patches (K padded to 16, spatial tiled)."""
    x = jnp.transpose(state_nchw, (0, 2, 3, 1))              # NCHW -> NHWC
    patches, Ho, Wo = extract_patches(x, k=3, s=2, p=1)
    B = patches.shape[0]
    s_true = Ho * Wo
    kkc = patches.shape[-1]
    kkcp = _round_up(kkc, 16)                                # bf16 sublane tile
    n_tiles = _cdiv(s_true, MAX_TILE_S)                      # usually 1 for ALE
    tile_s = _round_up(_cdiv(s_true, n_tiles), 16)
    s_pad = tile_s * n_tiles
    pm = patches.reshape(B, s_true, kkc)
    pm = jnp.pad(pm, ((0, 0), (0, s_pad - s_true), (0, kkcp - kkc)))
    return pm.astype(jnp.bfloat16), s_true, tile_s, n_tiles


def _kaiming_normal_conv(key, cout, cin, kh, kw):
    fan_in = cin * kh * kw
    std = (2.0 / fan_in) ** 0.5
    return std * jax.random.normal(key, (cout, cin, kh, kw), jnp.float32)


def _xavier_uniform(key, out_f, in_f):
    bound = (6.0 / (in_f + out_f)) ** 0.5
    return jax.random.uniform(key, (out_f, in_f), jnp.float32, -bound, bound)


def init_backbone(key, in_channels, out_dim):
    k = jax.random.split(key, 6)
    eps = 1e-5
    kkc = 9 * in_channels
    kkcp = _round_up(kkc, 16)

    # stem Conv3x3/s2 (no bias) with BatchNorm folded in.
    # NOTE: fold assumes init stats (mean=0, var=1, gamma=1, beta=0); when
    # loading trained weights the fold must use the real running stats.
    stem = _kaiming_normal_conv(k[0], 16, in_channels, 3, 3)        # (16,Cin,3,3)
    stem2d = jnp.transpose(stem, (2, 3, 1, 0)).reshape(kkc, 16)     # (kh,kw,cin)->cols
    bn_scale = 1.0 / jnp.sqrt(jnp.float32(1.0 + eps))
    stem2d = jnp.pad(stem2d * bn_scale, ((0, kkcp - kkc), (0, 0)))
    stem_b = jnp.zeros((1, 16), jnp.float32)                        # folded BN shift

    # TODO(synk): the 11 inverted-residual blocks (depthwise conv + SE) of
    # MobileNetV3-small are collapsed into this single 1x1 projection to 576 ch.
    proj = _kaiming_normal_conv(k[1], FEAT, 16, 1, 1).reshape(FEAT, 16).T
    proj = jnp.pad(proj, ((0, 0), (0, FEAT_PAD - FEAT)))            # (16, FEAT_PAD)

    w1 = _xavier_uniform(k[2], HIDDEN, FEAT).T                      # (FEAT, HIDDEN)
    w1 = jnp.pad(w1, ((0, FEAT_PAD - FEAT), (0, 0)))
    b1 = 0.01 * jax.random.normal(k[3], (HIDDEN,), jnp.float32)

    out_pad = _round_up(max(out_dim, 1), LANE)
    w2 = _xavier_uniform(k[4], out_dim, HIDDEN).T                   # (HIDDEN, out)
    w2 = jnp.pad(w2, ((0, 0), (0, out_pad - out_dim)))
    b2 = 0.01 * jax.random.normal(k[5], (out_dim,), jnp.float32)
    b2 = jnp.pad(b2, (0, out_pad - out_dim))

    return dict(
        stem_w=stem2d.astype(jnp.bfloat16),
        stem_b=stem_b,
        proj_w=proj.astype(jnp.bfloat16),
        w1=w1.astype(jnp.bfloat16), b1=b1.reshape(1, HIDDEN),
        w2=w2.astype(jnp.bfloat16), b2=b2.reshape(1, out_pad),
        out_dim=out_dim, out_pad=out_pad)


def _block_diag(mats):
    n = len(mats)
    if n == 1:
        return mats[0]
    r, c = mats[0].shape
    rows = []
    for i, m in enumerate(mats):
        row = [jnp.zeros((r, c), m.dtype) for _ in range(n)]
        row[i] = m
        rows.append(jnp.concatenate(row, axis=1))
    return jnp.concatenate(rows, axis=0)


def make_trunk(nets):
    """Fuse 1..2 backbones: stem weights stacked along N, proj block-diagonal."""
    stem_w = jnp.concatenate([p['stem_w'] for p in nets], axis=1)   # (kkcp, 16n)
    stem_b = jnp.concatenate([p['stem_b'] for p in nets], axis=1)   # (1, 16n)
    proj_w = _block_diag([p['proj_w'] for p in nets])               # (16n, n*FEAT_PAD)
    return dict(stem_w=stem_w, stem_b=stem_b,
                proj_w=proj_w.astype(jnp.bfloat16), n_nets=len(nets))


class ActorCritic:
    def __init__(self, action_dim, in_channels, has_continuous, action_scaling, key):
        # TODO(synk): continuous-action branch (tanh-scaled mu, softplus std Normal)
        # not implemented; ALE environments use the discrete Categorical branch.
        assert not has_continuous, "only the discrete (ALE) branch is implemented"
        del action_scaling
        ka, kc = jax.random.split(key)
        self.actor = init_backbone(ka, in_channels, action_dim)
        self.critic = init_backbone(kc, in_channels, 1)
        self.action_dim = action_dim
        # fused trunk weight bundles precomputed once
        self._trunk_actor = make_trunk([self.actor])
        self._trunk_critic = make_trunk([self.critic])
        self._trunk_both = make_trunk([self.actor, self.critic])

    def _pooled(self, state, trunk):
        patches, s_true, tile_s, n_tiles = prepare_patches(state)
        return backbone_pooled(trunk, patches, s_true, tile_s, n_tiles)

    def get_dist(self, state):
        pooled = self._pooled(state, self._trunk_actor)          # (B, FEAT_PAD)
        return dist_head(pooled, self.actor, self.action_dim)    # Categorical probs

    def get_value(self, state):
        pooled = self._pooled(state, self._trunk_critic)
        return value_head(pooled, self.critic)                   # (B,)

    def get_evaluate(self, state, action):
        # one backbone kernel runs actor AND critic sharing the patch stream
        pooled = self._pooled(state, self._trunk_both)           # (B, 2*FEAT_PAD)
        packed = eval_head(pooled, self.actor, self.critic, action, self.action_dim)
        log_probs = packed[:, 0]
        entropy = packed[:, 1]
        state_value = packed[:, 2]
        return log_probs, state_value, entropy


if __name__ == "__main__":
    key = jax.random.PRNGKey(0)
    kp, kx, ka = jax.random.split(key, 3)

    B, C, H, W = 2, 4, 16, 16
    action_dim = 6

    model = ActorCritic(action_dim, C, has_continuous=False, action_scaling=1.0, key=kp)
    state = jax.random.normal(kx, (B, C, H, W), jnp.float32)      # NCHW, like PyTorch
    action = jax.random.randint(ka, (B,), 0, action_dim)

    log_probs, state_value, entropy = model.get_evaluate(state, action)
    probs = model.get_dist(state)
    value_only = model.get_value(state)
    jax.block_until_ready((log_probs, state_value, entropy, probs, value_only))

    assert log_probs.shape == (B,) and state_value.shape == (B,) and entropy.shape == (B,)
    assert probs.shape == (B, action_dim) and value_only.shape == (B,)
    assert abs(float(jnp.sum(probs[0])) - 1.0) < 1e-3
    print("KERNEL_OK")
</pallas_src>

<mosaic_0001>
module attributes {stable_mosaic.version = 11 : i64} {
  func.func @_backbone_kernel(%arg0: i32, %arg1: i32, %arg2: memref<1x64x48xbf16, #tpu.memory_space<vmem>>, %arg3: memref<48x32xbf16, #tpu.memory_space<vmem>>, %arg4: memref<1x32xf32, #tpu.memory_space<vmem>>, %arg5: memref<32x1280xbf16, #tpu.memory_space<vmem>>, %arg6: memref<1x1x1280xbf16, #tpu.memory_space<vmem>>, %arg7: memref<1x1280xf32, #tpu.memory_space<vmem>>) attributes {dimension_semantics = [#tpu.dimension_semantics<parallel>, #tpu.dimension_semantics<arbitrary>], iteration_bounds = array<i64: 2, 1>, scalar_prefetch = 0 : i64, scratch_operands = 1 : i64, tpu.core_type = #tpu.core_type<tc>, window_params = [{transform_indices = @transform_0, window_bounds = array<i64: 1, 64, 48>}, {pipeline_mode = #tpu.pipeline_mode<synchronous>, transform_indices = @transform_1, window_bounds = array<i64: 48, 32>}, {pipeline_mode = #tpu.pipeline_mode<synchronous>, transform_indices = @transform_2, window_bounds = array<i64: 1, 32>}, {pipeline_mode = #tpu.pipeline_mode<synchronous>, transform_indices = @transform_3, window_bounds = array<i64: 32, 1280>}, {transform_indices = @transform_4, window_bounds = array<i64: 1, 1, 1280>}]} {
    %c0_i32 = arith.constant 0 : i32
    %0 = arith.cmpi eq, %arg1, %c0_i32 : i32
    %1 = arith.extui %0 : i1 to i32
    %c0_i32_0 = arith.constant 0 : i32
    %2 = arith.cmpi ne, %1, %c0_i32_0 : i32
    scf.if %2 {
      %cst_25 = arith.constant 0.000000e+00 : f32
      %39 = vector.broadcast %cst_25 : f32 to vector<1x1280xf32>
      %c0_26 = arith.constant 0 : index
      %c0_27 = arith.constant 0 : index
      %40 = vector.load %arg7[%c0_26, %c0_27] : memref<1x1280xf32, #tpu.memory_space<vmem>>, vector<1x1280xf32>
      tpu.vector_store %arg7[%c0_26, %c0_27], %39 {strides = array<i32>} : memref<1x1280xf32, #tpu.memory_space<vmem>>, vector<1x1280xf32>,
    } else {
    }
    %c0 = arith.constant 0 : index
    %c0_1 = arith.constant 0 : index
    %c0_2 = arith.constant 0 : index
    %3 = vector.load %arg2[%c0, %c0_1, %c0_2] : memref<1x64x48xbf16, #tpu.memory_space<vmem>>, vector<1x64x48xbf16>
    %4 = vector.shape_cast %3 : vector<1x64x48xbf16> to vector<64x48xbf16>
    %c0_3 = arith.constant 0 : index
    %c0_4 = arith.constant 0 : index
    %5 = vector.load %arg3[%c0_3, %c0_4] : memref<48x32xbf16, #tpu.memory_space<vmem>>, vector<48x32xbf16>
    %cst = arith.constant dense<0.000000e+00> : vector<64x32xf32>
    %6 = tpu.matmul %4, %5, %cst {dimension_numbers = #tpu.dot_dimension_numbers<[1], [0], [0], [1], [0, 0, 1, 1], [], []>} : vector<64x48xbf16>, vector<48x32xbf16>, vector<64x32xf32> -> vector<64x32xf32>
    %c0_5 = arith.constant 0 : index
    %c0_6 = arith.constant 0 : index
    %7 = vector.load %arg4[%c0_5, %c0_6] : memref<1x32xf32, #tpu.memory_space<vmem>>, vector<1x32xf32>
    %8 = vector.broadcast %7 : vector<1x32xf32> to vector<64x32xf32>
    %9 = arith.addf %6, %8 : vector<64x32xf32>
    %cst_7 = arith.constant 3.000000e+00 : f32
    %10 = vector.broadcast %cst_7 : f32 to vector<64x32xf32>
    %11 = arith.addf %9, %10 : vector<64x32xf32>
    %cst_8 = arith.constant 0.000000e+00 : f32
    %cst_9 = arith.constant 6.000000e+00 : f32
    %12 = vector.broadcast %cst_8 : f32 to vector<64x32xf32>
    %13 = arith.maximumf %12, %11 : vector<64x32xf32>
    %14 = vector.broadcast %cst_9 : f32 to vector<64x32xf32>
    %15 = arith.minimumf %14, %13 : vector<64x32xf32>
    %16 = arith.mulf %9, %15 : vector<64x32xf32>
    %cst_10 = arith.constant 0.166666672 : f32
    %17 = vector.broadcast %cst_10 : f32 to vector<64x32xf32>
    %18 = arith.mulf %16, %17 : vector<64x32xf32>
    %19 = arith.truncf %18 : vector<64x32xf32> to vector<64x32xbf16>
    %c0_11 = arith.constant 0 : index
    %c0_12 = arith.constant 0 : index
    %20 = vector.load %arg5[%c0_11, %c0_12] : memref<32x1280xbf16, #tpu.memory_space<vmem>>, vector<32x1280xbf16>
    %cst_13 = arith.constant dense<0.000000e+00> : vector<64x1280xf32>
    %21 = tpu.matmul %19, %20, %cst_13 {dimension_numbers = #tpu.dot_dimension_numbers<[1], [0], [0], [1], [0, 0, 1, 1], [], []>} : vector<64x32xbf16>, vector<32x1280xbf16>, vector<64x1280xf32> -> vector<64x1280xf32>
    %cst_14 = arith.constant 3.000000e+00 : f32
    %22 = vector.broadcast %cst_14 : f32 to vector<64x1280xf32>
    %23 = arith.addf %21, %22 : vector<64x1280xf32>
    %cst_15 = arith.constant 0.000000e+00 : f32
    %cst_16 = arith.constant 6.000000e+00 : f32
    %24 = vector.broadcast %cst_15 : f32 to vector<64x1280xf32>
    %25 = arith.maximumf %24, %23 : vector<64x1280xf32>
    %26 = vector.broadcast %cst_16 : f32 to vector<64x1280xf32>
    %27 = arith.minimumf %26, %25 : vector<64x1280xf32>
    %28 = arith.mulf %21, %27 : vector<64x1280xf32>
    %cst_17 = arith.constant 0.166666672 : f32
    %29 = vector.broadcast %cst_17 : f32 to vector<64x1280xf32>
    %30 = arith.mulf %28, %29 : vector<64x1280xf32>
    %c0_18 = arith.constant 0 : index
    %c0_19 = arith.constant 0 : index
    %31 = vector.load %arg7[%c0_18, %c0_19] : memref<1x1280xf32, #tpu.memory_space<vmem>>, vector<1x1280xf32>
    %cst_20 = arith.constant dense<0.000000e+00> : vector<1280xf32>
    %32 = vector.multi_reduction <add>, %30, %cst_20 [0] : vector<64x1280xf32> to vector<1280xf32>
    %33 = vector.shape_cast %32 : vector<1280xf32> to vector<1x1280xf32>
    %34 = arith.addf %31, %33 : vector<1x1280xf32>
    %c0_21 = arith.constant 0 : index
    %c0_22 = arith.constant 0 : index
    %35 = vector.load %arg7[%c0_21, %c0_22] : memref<1x1280xf32, #tpu.memory_space<vmem>>, vector<1x1280xf32>
    tpu.vector_store %arg7[%c0_21, %c0_22], %34 {strides = array<i32>} : memref<1x1280xf32, #tpu.memory_space<vmem>>, vector<1x1280xf32>,
    %c0_i32_23 = arith.constant 0 : i32
    %36 = arith.cmpi eq, %arg1, %c0_i32_23 : i32
    %37 = arith.extui %36 : i1 to i32
    %c0_i32_24 = arith.constant 0 : i32
    %38 = arith.cmpi ne, %37, %c0_i32_24 : i32
    scf.if %38 {
      %c0_25 = arith.constant 0 : index
      %c0_26 = arith.constant 0 : index
      %39 = vector.load %arg7[%c0_25, %c0_26] : memref<1x1280xf32, #tpu.memory_space<vmem>>, vector<1x1280xf32>
      %cst_27 = arith.constant 1.562500e-02 : f32
      %40 = vector.broadcast %cst_27 : f32 to vector<1x1280xf32>
      %41 = arith.mulf %39, %40 : vector<1x1280xf32>
      %42 = arith.truncf %41 : vector<1x1280xf32> to vector<1x1280xbf16>
      %c0_28 = arith.constant 0 : index
      %c0_29 = arith.constant 0 : index
      %c0_30 = arith.constant 0 : index
      %43 = vector.load %arg6[%c0_28, %c0_29, %c0_30] : memref<1x1x1280xbf16, #tpu.memory_space<vmem>>, vector<1x1x1280xbf16>
      %44 = vector.shape_cast %43 : vector<1x1x1280xbf16> to vector<1x1280xbf16>
      %45 = vector.shape_cast %42 : vector<1x1280xbf16> to vector<1x1x1280xbf16>
      tpu.vector_store %arg6[%c0_28, %c0_29, %c0_30], %45 {strides = array<i32>} : memref<1x1x1280xbf16, #tpu.memory_space<vmem>>, vector<1x1x1280xbf16>,
    } else {
    }
    return
  }
  func.func @transform_0(%arg0: i32, %arg1: i32) -> (i32, i32, i32) {
    %c0_i32 = arith.constant 0 : i32
    %c0_i32_0 = arith.constant 0 : i32
    return %arg0, %arg1, %c0_i32 : i32, i32, i32
  }
  func.func @transform_1(%arg0: i32, %arg1: i32) -> (i32, i32) {
    %c0_i32 = arith.constant 0 : i32
    %c0_i32_0 = arith.constant 0 : i32
    %c0_i32_1 = arith.constant 0 : i32
    return %c0_i32, %c0_i32_0 : i32, i32
  }
  func.func @transform_2(%arg0: i32, %arg1: i32) -> (i32, i32) {
    %c0_i32 = arith.constant 0 : i32
    %c0_i32_0 = arith.constant 0 : i32
    %c0_i32_1 = arith.constant 0 : i32
    return %c0_i32, %c0_i32_0 : i32, i32
  }
  func.func @transform_3(%arg0: i32, %arg1: i32) -> (i32, i32) {
    %c0_i32 = arith.constant 0 : i32
    %c0_i32_0 = arith.constant 0 : i32
    %c0_i32_1 = arith.constant 0 : i32
    return %c0_i32, %c0_i32_0 : i32, i32
  }
  func.func @transform_4(%arg0: i32, %arg1: i32) -> (i32, i32, i32) {
    %c0_i32 = arith.constant 0 : i32
    %c0_i32_0 = arith.constant 0 : i32
    %c0_i32_1 = arith.constant 0 : i32
    return %arg0, %c0_i32, %c0_i32_0 : i32, i32, i32
  }
}

</mosaic_0001>

<bundles_post_ra>
// kernel: tpu_custom_call.1
= control target key start
LH: loop header
LB: loop body
LE: loop exit
PB: predicated region body
PF: predicated region fallthrough
CT: control target
= control target key end

     0   :  { %9 = vsyncpa [#allocation4], 0  ;;  %s1896_s15 = smov 0   ;;  %s1898_s16 = smov 0   ;;  %s2258_s0 = inlined_call_operand.vmem [shape: bf16[2,64,48], index: 0, kind: input, shape index: {}]   ;;  %s2259_s1 = inlined_call_operand.vmem [shape: bf16[48,32], index: 1, kind: input, shape index: {}]   ;;  %s2260_s2 = inlined_call_operand.vmem [shape: f32[1,32], index: 2, kind: input, shape index: {}]   ;;  %s2261_s3 = inlined_call_operand.hbm [shape: bf16[32,1280], index: 3, kind: input, shape index: {}]   ;;  %s2262_s4 = inlined_call_operand.vmem [shape: bf16[2,1,1280], index: 4, kind: output, shape index: {}]  }
   0x1   :  { %s1900_s17 = smov 0  }
   0x2 LB: > { %s1576_s18 = sadd.s32 4294967295, %s1865_s17   ;;  %s27_s19 = sadd.s32 1, %s1861_s16  ;;  %s1865_s17 = sphi %s1900_s17, %s15_s17   ;;  %s1861_s16 = sphi %s1898_s16, %s2288_s16   ;;  %s1857_s15 = sphi %s1896_s15, %s2287_s15  }
   0x3   : > { %p29_p0 = scmp.ge.s32.totalorder %s27_s19, 2  ;;  %p1578_p1 = scmp.ge.s32.totalorder %s1865_s17, 1 }
   0x4   : > { %p149_p2 = scmp.lt.s32.totalorder %s1865_s17, 3  ;;  %p1778_p4 = scmp.eq.s32.totalorder %s1576_s18, 0 }
   0x5   : > { %s2290_s19 = smov (%p29_p0, %s27_s19), 0  ;;  %s166_s22 = sshll.u32 %s2261_s3, 4  ;;  %s167_s22 = int_to_ptr.hbm [resolvable:$true] %s166_s22 }
   0x6   : > { %p150_p3 = pnand %p1578_p1, %p149_p2  ;;  %s1867_s23 = smov [#allocation3]  }
   0x7   : > { %s168_s24 = sshll.u32 %s1867_s23, 4  ;;  %s1868_s25 = smov 640   ;;  %s169_s24 = int_to_ptr.vmem [resolvable:$true] %s168_s24 }
   0x8   : > { %p1774_p5 = pneg %p150_p3  ;;  %s1869_s26 = smov 40  }
   0x9   : > { %197 = sbr.rel (%p150_p3) target bundleno = 540 (0x21c), region = 36 }
   0xa   : > { %p1775_p6 = pnand %p1778_p4, %p1774_p5 }
   0xc   : > { %1777 = dma.hbm_to_vmem [thread:$0]  (!%p1775_p6), %s167_s22, 2560, %s169_s24, [#allocation4], %s1868_s25, %s1868_s25, %s1869_s26  }
   0xe   : > { %1852 = dma.done.wait (%p1778_p4), [#allocation4], 2560  }
   0xf   : > { %1854 = vsyncadd (%p1778_p4), [#allocation4], 4294964736  ;;  %p228_p7 = scmp.lt.s32.totalorder %s1857_s15, 1  ;;  %v1746_v0 = vld [vmem:[%s2259_s1 + $0x10] sm:$0xff]  ;;  %v1745_v1 = vld [vmem:[%s2259_s1 + $0x8] sm:$0xff]  ;;  %vm308_vm0 = vcmask 392192  }
  0x10   : > { %326 = vmatpush.bf16.msra.mxu0 %v1746_v0  ;;  %v1744_v2 = vld [vmem:[%s2259_s1] sm:$0xff]  ;;  %v1659_v7 = vld [vmem:[#allocation3 + $0x50] sm:$0xf]  ;;  %v1763_v13 = vld [vmem:[#allocation3 + $0x7c] sm:$0xf0]  ;;  %vm514_vm1 = vcmask 261120  }
  0x11   : > { %s2292_s15 = smov (!%p228_p7, %s1857_s15), 1  ;;  %v1762_v8 = vld [vmem:[#allocation3 + $0x74] sm:$0xf0]  ;;  %v1757_v9 = vld [vmem:[#allocation3 + $0x54] sm:$0xf]  ;;  %vm1367_vm2 = vcmask 1040384  }
  0x12   : > { %s1739_s5 = sshll.u32 %s2292_s15, 5  ;;  %v1660_v10 = vor.u32 %v1762_v8, %v1659_v7  ;;  %v1661_v11 = vld [vmem:[#allocation3 + $0x78] sm:$0xf0]  ;;  %v1667_v12 = vld [vmem:[#allocation3 + $0x58] sm:$0xf]  ;;  %vm2265_vm3 = vcmask 1042434  }
  0x13   : > { %s235_s10 = scalar_lea.vmem %s2258_s0, %s1739_s5  ;;  %v1664_v14 = vor.u32 %v1757_v9, %v1661_v11  ;;  %v1668_v15 = vor.u32 %v1763_v13, %v1667_v12  ;;  %v1619_v16 = vld [vmem:[#allocation3] sm:$0xf]  ;;  %v1752_v17 = vld [vmem:[#allocation3 + $0x24] sm:$0xf0]  ;;  %v1747_v18 = vld [vmem:[#allocation3 + $0x4] sm:$0xf] }
  0x14   : > { %327 = vmatpush.bf16.msra.mxu0 %v1745_v1  ;;  %v1740_v3 = vld [vmem:[%s235_s10] sm:$0xff]  ;;  %v1741_v4 = vld [vmem:[%s235_s10 + $0x8] sm:$0xff]  ;;  %v1742_v5 = vld [vmem:[%s235_s10 + $0x10] sm:$0xff]  ;;  %1767 = vmatpush.bf16.msra.mxu1 %v1660_v10  ;;  %v1620_v19 = vor.u32 %v1752_v17, %v1619_v16  ;;  %vm2264_vm4 = vcmask 1041408   ;;  %vm1373_vm5 = vcmask 1044484   ;;  %vm1462_vm8 = vcmask 1041409  }
  0x15   : > { %v1743_v6 = vld [vmem:[%s235_s10 + $0x18] sm:$0xff]  ;;  %562 = vmatpush.bf16.msra.mxu2 %v1664_v14  ;;  %591 = vmatpush.bf16.msra.mxu3 %v1668_v15  ;;  %v1627_v21 = vld [vmem:[#allocation3 + $0x8] sm:$0xf]  ;;  %v1759_v25 = vld [vmem:[#allocation3 + $0x64] sm:$0xf]  ;;  %vm1470_vm15 = vcmask 1043459  }
  0x16   : > { %v1621_v20 = vld [vmem:[#allocation3 + $0x28] sm:$0xf0]  ;;  %v1753_v22 = vld [vmem:[#allocation3 + $0x2c] sm:$0xf0]  ;;  %v1936_v28 = vld [vmem:[%s2260_s2] ss:$0 sm:$0xff] }
  0x17   : > { %v1624_v23 = vor.u32 %v1747_v18, %v1621_v20  ;;  %v1628_v24 = vor.u32 %v1753_v22, %v1627_v21  ;;  %v1677_v26 = vld [vmem:[#allocation3 + $0x88] sm:$0xf0]  ;;  %v1675_v32 = vld [vmem:[#allocation3 + $0x60] sm:$0xf]  ;;  %v1764_v33 = vld [vmem:[#allocation3 + $0x84] sm:$0xf0] }
  0x18   : > { %328 = vmatpush.bf16.msra.mxu0 %v1744_v2  ;;  %1768 = vmatpush.bf16.msra.mxu1 %v1620_v19  ;;  %v1680_v27 = vor.u32 %v1759_v25, %v1677_v26  ;;  %v1676_v34 = vor.u32 %v1764_v33, %v1675_v32  ;;  %v1749_v55 = vld [vmem:[#allocation3 + $0x14] sm:$0xf]  ;;  %v1637_v56 = vld [vmem:[#allocation3 + $0x38] sm:$0xf0]  ;;  %v1683_v59 = vld [vmem:[#allocation3 + $0x68] sm:$0xf] }
  0x19   : > { %563 = vmatpush.bf16.msra.mxu2 %v1624_v23  ;;  %592 = vmatpush.bf16.msra.mxu3 %v1628_v24  ;;  %v1640_v58 = vor.u32 %v1749_v55, %v1637_v56  ;;  %v1765_v60 = vld [vmem:[#allocation3 + $0x8c] sm:$0xf0]  ;;  %v1754_v11 = vld [vmem:[#allocation3 + $0x34] sm:$0xf0]  ;;  %v1758_v15 = vld [vmem:[#allocation3 + $0x5c] sm:$0xf] }
  0x1a   : > { %v1684_v63 = vor.u32 %v1765_v60, %v1683_v59  ;;  %v1669_v16 = vld [vmem:[#allocation3 + $0x80] sm:$0xf0]  ;;  %v1748_v17 = vld [vmem:[#allocation3 + $0xc] sm:$0xf]  ;;  %v1629_v20 = vld [vmem:[#allocation3 + $0x30] sm:$0xf0] }
  0x1b   : > { %1613 = vmatmul.msk.bf16.vlgmr.msra.gmra.mxu0 %vm308_vm0, %v1740_v3  ;;  %v1643_v3 = vld [vmem:[#allocation3 + $0x18] sm:$0xf]  ;;  %v1632_v23 = vor.u32 %v1748_v17, %v1629_v20  ;;  %v1645_v60 = vld [vmem:[#allocation3 + $0x40] sm:$0xf0]  ;;  %vm1460_vm7 = vsmask.f32 256 }
  0x1c   : > { %533 = vmatpush.bf16.msrb.mxu0 %v1660_v10  ;;  %v1635_v10 = vld [vmem:[#allocation3 + $0x10] sm:$0xf]  ;;  %vm1463_vm9 = vsmask.f32 1280  ;;  %vm2159_vm10 = vmand %vm1367_vm2, %vm1460_vm7  ;;  %vm1467_vm12 = vsmask.f32 2304 }
  0x1d   : > { %678 = vmatpush.bf16.msrb.mxu3 %v1680_v27  ;;  %649 = vmatpush.bf16.msrb.mxu2 %v1676_v34  ;;  %v1636_v12 = vor.u32 %v1754_v11, %v1635_v10  ;;  %vm2165_vm11 = vmand %vm1462_vm8, %vm1463_vm9  ;;  %vm1475_vm8 = vsmask.f32 4352  ;;  %vm1375_vm9 = vcmask 1046534   ;;  %s1769_s13 = smul.u32 10, %s2292_s15 }
  0x1e   : > { %vm2263_vm13 = vmor %vm2165_vm11, %vm2159_vm10 }
  0x1f   : > { %vm1468_vm14 = vmand %vm2265_vm3, %vm1467_vm12  ;;  %s240_s18 = scalar_lea.vmem %s2262_s4, %s1769_s13 }
  0x20   : > { %534 = vmatpush.bf16.msrb.mxu0 %v1620_v19  ;;  %v1672_v19 = vor.u32 %v1758_v15, %v1669_v16 }
  0x21   : > { %679 = vmatpush.bf16.msrb.mxu3 %v1640_v58  ;;  %650 = vmatpush.bf16.msrb.mxu2 %v1636_v12  ;;  %v1750_v58 = vld [vmem:[#allocation3 + $0x1c] sm:$0xf] }
  0x22   : > { %620 = vmatpush.bf16.msrb.mxu1 %v1672_v19 }
  0x24   : > { %707 = vmatpush.bf16.msra.mxu0 %v1684_v63  ;;  %v1648_v63 = vor.u32 %v1750_v58, %v1645_v60 }
  0x26   : > { %621 = vmatpush.bf16.msrb.mxu1 %v1632_v23 }
  0x2b   : > { %1614 = vmatmul.msk.bf16.gmra.mxu0 %vm308_vm0, %v1741_v4  ;;  %v1755_v4 = vld [vmem:[#allocation3 + $0x3c] sm:$0xf0] }
  0x2c   : > { %v1644_v8 = vor.u32 %v1755_v4, %v1643_v3 }
  0x2e   : > { %708 = vmatpush.bf16.msra.mxu0 %v1644_v8 }
  0x3b   : > { %1615 = vmatmul.msk.bf16.gmra.mxu0 %vm308_vm0, %v1742_v5 }
  0x4b   : > { %1616 = vmatmul.msk.bf16.gmra.mxu0 %vm308_vm0, %v1743_v6  ;;  %vm1471_vm0 = vsmask.f32 3328 }
  0x4c   : > { %vm2183_vm7 = vmand %vm1470_vm15, %vm1471_vm0  ;;  %vm1379_vm0 = vcmask 1043456  }
  0x4d   : > { %vm1476_vm15 = vmand %vm1373_vm5, %vm1475_vm8 }
  0x98   : > { %v330_v29 = vpop.f32.mrf.mxu0 }
  0x99   : > { %v331_v30 = vadd.f32 %v1936_v28, %v330_v29 }
  0x9b   : > { %v350_v31 = vadd.f32 3.0, %v331_v30 }
  0x9d   : > { %v358_v35 = vmax.f32 %v350_v31, 0.0 }
  0x9f   : > { %v366_v38 = vmin.f32 %v358_v35, 6.0 }
  0xa0   : > { %v332_v36 = vpop.f32.mrf.mxu0 }
  0xa1   : > { %v333_v37 = vadd.f32 %v1936_v28, %v332_v36  ;;  %v374_v41 = vmul.f32 %v366_v38, %v331_v30  ;;  %v1693_v38 = vld [vmem:[#allocation3 + $0x98] sm:$0xf0] }
  0xa3   : > { %v351_v39 = vadd.f32 3.0, %v333_v37  ;;  %v382_v46 = vmul.f32 0.16666667, %v374_v41  ;;  %v1691_v41 = vld [vmem:[#allocation3 + $0x70] sm:$0xf] }
  0xa5   : > { %v359_v40 = vmax.f32 %v351_v39, 0.0 }
  0xa7   : > { %v367_v42 = vmin.f32 %v359_v40, 6.0 }
  0xa8   : > { %v335_v43 = vpop.f32.mrf.mxu0 }
  0xa9   : > { %v375_v44 = vmul.f32 %v367_v42, %v333_v37  ;;  %v336_v45 = vadd.f32 %v1936_v28, %v335_v43  ;;  %v1761_v37 = vld [vmem:[#allocation3 + $0x74] sm:$0xf]  ;;  %v1766_v42 = vld [vmem:[#allocation3 + $0x94] sm:$0xf0] }
  0xaa   : > { %v1696_v40 = vor.u32 %v1761_v37, %v1693_v38  ;;  %v1692_v43 = vor.u32 %v1766_v42, %v1691_v41 }
  0xab   : > { %v383_v47 = vmul.f32 0.16666667, %v375_v44  ;;  %v352_v48 = vadd.f32 3.0, %v336_v45 }
  0xad   : > { %v1941_v49 = vpack.c.bf16 %v383_v47, %v382_v46  ;;  %v360_v50 = vmax.f32 %v352_v48, 0.0 }
  0xaf   : > { %1697 = vmatmul.msk.bf16.vlgmr.msrb.gmra.mxu0 %vm514_vm1, %v1941_v49  ;;  %1701 = vmatmul.msk.bf16.vlgmr.msra.gmra.mxu2 %vm514_vm1, %v1941_v49  ;;  %v368_v53 = vmin.f32 %v360_v50, 6.0 }
  0xb0   : > { %1705 = vmatmul.msk.bf16.vlgmr.msra.gmra.mxu3 %vm514_vm1, %v1941_v49  ;;  %v337_v51 = vpop.f32.mrf.mxu0  ;;  %765 = vmatpush.bf16.msra.mxu2 %v1692_v43 }
  0xb1   : > { %v338_v52 = vadd.f32 %v1936_v28, %v337_v51  ;;  %v376_v61 = vmul.f32 %v368_v53, %v336_v45  ;;  %794 = vmatpush.bf16.msra.mxu3 %v1696_v40  ;;  %v1760_v51 = vld [vmem:[#allocation3 + $0x6c] sm:$0xf] }
  0xb3   : > { %v353_v54 = vadd.f32 3.0, %v338_v52  ;;  %v384_v5 = vmul.f32 0.16666667, %v376_v61  ;;  %v1651_v61 = vld [vmem:[#allocation3 + $0x20] sm:$0xf] }
  0xb5   : > { %v361_v57 = vmax.f32 %v353_v54, 0.0 }
  0xb7   : > { %v369_v62 = vmin.f32 %v361_v57, 6.0  ;;  %v1653_v57 = vld [vmem:[#allocation3 + $0x48] sm:$0xf0] }
  0xb8   : > { %v340_v0 = vpop.f32.mrf.mxu0 }
  0xb9   : > { %v377_v1 = vmul.f32 %v369_v62, %v338_v52  ;;  %v341_v2 = vadd.f32 %v1936_v28, %v340_v0  ;;  %v1685_v52 = vld [vmem:[#allocation3 + $0x90] sm:$0xf0]  ;;  %v1756_v62 = vld [vmem:[#allocation3 + $0x44] sm:$0xf0] }
  0xba   : > { %v1688_v56 = vor.u32 %v1760_v51, %v1685_v52  ;;  %v1652_v0 = vor.u32 %v1756_v62, %v1651_v61 }
  0xbb   : > { %v385_v6 = vmul.f32 0.16666667, %v377_v1  ;;  %v354_v7 = vadd.f32 3.0, %v341_v2 }
  0xbc   : > { %766 = vmatpush.bf16.msra.mxu2 %v1652_v0 }
  0xbd   : > { %v1951_v9 = vpack.c.bf16 %v385_v6, %v384_v5  ;;  %v362_v13 = vmax.f32 %v354_v7, 0.0 }
  0xbf   : > { %1698 = vmatmul.msk.bf16.gmra.mxu0 %vm514_vm1, %v1951_v9  ;;  %1702 = vmatmul.msk.bf16.gmra.mxu2 %vm514_vm1, %v1951_v9  ;;  %v370_v21 = vmin.f32 %v362_v13, 6.0 }
  0xc0   : > { %1706 = vmatmul.msk.bf16.gmra.mxu3 %vm514_vm1, %v1951_v9  ;;  %v342_v14 = vpop.f32.mrf.mxu0 }
  0xc1   : > { %v343_v18 = vadd.f32 %v1936_v28, %v342_v14  ;;  %v378_v25 = vmul.f32 %v370_v21, %v341_v2 }
  0xc3   : > { %v355_v22 = vadd.f32 3.0, %v343_v18  ;;  %v386_v31 = vmul.f32 0.16666667, %v378_v25 }
  0xc5   : > { %v363_v24 = vmax.f32 %v355_v22, 0.0 }
  0xc7   : > { %v371_v26 = vmin.f32 %v363_v24, 6.0 }
  0xc8   : > { %v345_v27 = vpop.f32.mrf.mxu0 }
  0xc9   : > { %v379_v29 = vmul.f32 %v371_v26, %v343_v18  ;;  %v346_v30 = vadd.f32 %v1936_v28, %v345_v27 }
  0xcb   : > { %v387_v32 = vmul.f32 0.16666667, %v379_v29  ;;  %v356_v33 = vadd.f32 3.0, %v346_v30 }
  0xcd   : > { %v1961_v34 = vpack.c.bf16 %v387_v32, %v386_v31  ;;  %v364_v35 = vmax.f32 %v356_v33, 0.0 }
  0xcf   : > { %1699 = vmatmul.msk.bf16.gmra.mxu0 %vm514_vm1, %v1961_v34  ;;  %1703 = vmatmul.msk.bf16.gmra.mxu2 %vm514_vm1, %v1961_v34  ;;  %v372_v44 = vmin.f32 %v364_v35, 6.0 }
  0xd0   : > { %1707 = vmatmul.msk.bf16.gmra.mxu3 %vm514_vm1, %v1961_v34  ;;  %v347_v36 = vpop.f32.mrf.mxu0 }
  0xd1   : > { %v348_v39 = vadd.f32 %v1936_v28, %v347_v36  ;;  %v380_v47 = vmul.f32 %v372_v44, %v346_v30  ;;  %v1751_v28 = vld [vmem:[#allocation3 + $0x24] sm:$0xf] }
  0xd2   : > { %v1656_v59 = vor.u32 %v1751_v28, %v1653_v57 }
  0xd3   : > { %v357_v45 = vadd.f32 3.0, %v348_v39  ;;  %v388_v53 = vmul.f32 0.16666667, %v380_v47 }
  0xd4   : > { %795 = vmatpush.bf16.msra.mxu3 %v1656_v59 }
  0xd5   : > { %v365_v46 = vmax.f32 %v357_v45, 0.0 }
  0xd7   : > { %v373_v48 = vmin.f32 %v365_v46, 6.0 }
  0xd9   : > { %v381_v50 = vmul.f32 %v373_v48, %v348_v39 }
  0xdb   : > { %v389_v54 = vmul.f32 0.16666667, %v381_v50 }
  0xdd   : > { %v1970_v55 = vpack.c.bf16 %v389_v54, %v388_v53 }
  0xdf   : > { %1700 = vmatmul.msk.bf16.vlgmr.msra.gmra.mxu1 %vm514_vm1, %v1970_v55  ;;  %1704 = vmatmul.msk.bf16.gmra.mxu2 %vm514_vm1, %v1970_v55 }
  0xe0   : > { %1708 = vmatmul.msk.bf16.gmra.mxu3 %vm514_vm1, %v1970_v55  ;;  %1721 = vmatmul.msk.bf16.vlgmr.msra.gmra.mxu0 %vm514_vm1, %v1941_v49 }
  0xe1   : > { %736 = vmatpush.bf16.msra.mxu1 %v1688_v56 }
  0xe5   : > { %737 = vmatpush.bf16.msra.mxu1 %v1648_v63 }
  0xef   : > { %1709 = vmatmul.msk.bf16.vlgmr.msrb.gmra.mxu1 %vm514_vm1, %v1941_v49  ;;  %1713 = vmatmul.msk.bf16.vlgmr.msrb.gmra.mxu2 %vm514_vm1, %v1941_v49 }
  0xf0   : > { %1717 = vmatmul.msk.bf16.vlgmr.msrb.gmra.mxu3 %vm514_vm1, %v1941_v49  ;;  %1722 = vmatmul.msk.bf16.gmra.mxu0 %vm514_vm1, %v1951_v9 }
  0xff   : > { %1710 = vmatmul.msk.bf16.gmra.mxu1 %vm514_vm1, %v1951_v9  ;;  %1714 = vmatmul.msk.bf16.gmra.mxu2 %vm514_vm1, %v1951_v9 }
 0x100   : > { %1718 = vmatmul.msk.bf16.gmra.mxu3 %vm514_vm1, %v1951_v9  ;;  %1723 = vmatmul.msk.bf16.gmra.mxu0 %vm514_vm1, %v1961_v34 }
 0x10f   : > { %1711 = vmatmul.msk.bf16.gmra.mxu1 %vm514_vm1, %v1961_v34  ;;  %1715 = vmatmul.msk.bf16.gmra.mxu2 %vm514_vm1, %v1961_v34 }
 0x110   : > { %1719 = vmatmul.msk.bf16.gmra.mxu3 %vm514_vm1, %v1961_v34  ;;  %1724 = vmatmul.msk.bf16.gmra.mxu0 %vm514_vm1, %v1970_v55 }
 0x11f   : > { %1712 = vmatmul.msk.bf16.gmra.mxu1 %vm514_vm1, %v1970_v55  ;;  %1716 = vmatmul.msk.bf16.gmra.mxu2 %vm514_vm1, %v1970_v55 }
 0x120   : > { %1720 = vmatmul.msk.bf16.gmra.mxu3 %vm514_vm1, %v1970_v55 }
 0x12c   : > { %v536_v1 = vpop.f32.mrf.mxu0 }
 0x12d   : > { %v817_v2 = vadd.f32 3.0, %v536_v1 }
 0x12f   : > { %1725 = vmatmul.msk.bf16.vlgmr.msra.gmra.mxu1 %vm514_vm1, %v1941_v49  ;;  %1729 = vmatmul.msk.bf16.vlgmr.msra.gmra.mxu2 %vm514_vm1, %v1941_v49  ;;  %v897_v3 = vmax.f32 %v817_v2, 0.0 }
 0x130   : > { %1733 = vmatmul.msk.bf16.vlgmr.msra.gmra.mxu3 %vm514_vm1, %v1941_v49 }
 0x131   : > { %v977_v10 = vmin.f32 %v897_v3, 6.0 }
 0x132   : > { %v565_v4 = vpop.f32.mrf.mxu2 }
 0x133   : > { %v818_v5 = vadd.f32 3.0, %v565_v4  ;;  %v594_v6 = vpop.f32.mrf.mxu3  ;;  %v1057_v15 = vmul.f32 %v977_v10, %v536_v1 }
 0x134   : > { %v819_v7 = vadd.f32 3.0, %v594_v6  ;;  %v538_v8 = vpop.f32.mrf.mxu0 }
 0x135   : > { %v827_v11 = vadd.f32 3.0, %v538_v8  ;;  %v898_v12 = vmax.f32 %v818_v5, 0.0  ;;  %v1137_v24 = vmul.f32 0.16666667, %v1057_v15 }
 0x136   : > { %v899_v14 = vmax.f32 %v819_v7, 0.0 }
 0x137   : > { %v907_v13 = vmax.f32 %v827_v11, 0.0  ;;  %v978_v18 = vmin.f32 %v898_v12, 6.0 }
 0x138   : > { %v979_v22 = vmin.f32 %v899_v14, 6.0 }
 0x139   : > { %v987_v16 = vmin.f32 %v907_v13, 6.0  ;;  %v1058_v30 = vmul.f32 %v978_v18, %v565_v4 }
 0x13a   : > { %v567_v17 = vpop.f32.mrf.mxu2  ;;  %v1059_v35 = vmul.f32 %v979_v22, %v594_v6 }
 0x13b   : > { %v1067_v19 = vmul.f32 %v987_v16, %v538_v8  ;;  %v828_v20 = vadd.f32 3.0, %v567_v17  ;;  %v596_v21 = vpop.f32.mrf.mxu3  ;;  %v1138_v41 = vmul.f32 0.16666667, %v1058_v30 }
 0x13c   : > { %v829_v49 = vadd.f32 3.0, %v596_v21  ;;  %v541_v23 = vpop.f32.mrf.mxu0  ;;  %v1139_v46 = vmul.f32 0.16666667, %v1059_v35 }
 0x13d   : > { %v1147_v25 = vmul.f32 0.16666667, %v1067_v19  ;;  %v908_v26 = vmax.f32 %v828_v20, 0.0  ;;  %v837_v27 = vadd.f32 3.0, %v541_v23 }
 0x13e   : > { %v909_v29 = vmax.f32 %v829_v49, 0.0 }
 0x13f   : > { %v1219_v31 = vadd.f32 %v1147_v25, %v1137_v24  ;;  %v988_v32 = vmin.f32 %v908_v26, 6.0  ;;  %v917_v33 = vmax.f32 %v837_v27, 0.0  ;;  %1726 = vmatmul.msk.bf16.gmra.mxu1 %vm514_vm1, %v1951_v9  ;;  %1730 = vmatmul.msk.bf16.gmra.mxu2 %vm514_vm1, %v1951_v9 }
 0x140   : > { %v989_v36 = vmin.f32 %v909_v29, 6.0  ;;  %1734 = vmatmul.msk.bf16.gmra.mxu3 %vm514_vm1, %v1951_v9 }
 0x141   : > { %v1068_v37 = vmul.f32 %v988_v32, %v567_v17  ;;  %v997_v38 = vmin.f32 %v917_v33, 6.0 }
 0x142   : > { %v1069_v39 = vmul.f32 %v989_v36, %v596_v21  ;;  %v570_v40 = vpop.f32.mrf.mxu2 }
 0x143   : > { %v1148_v42 = vmul.f32 0.16666667, %v1068_v37  ;;  %v1077_v43 = vmul.f32 %v997_v38, %v541_v23  ;;  %v838_v44 = vadd.f32 3.0, %v570_v40  ;;  %v599_v45 = vpop.f32.mrf.mxu3 }
 0x144   : > { %v1149_v47 = vmul.f32 0.16666667, %v1069_v39  ;;  %v839_v48 = vadd.f32 3.0, %v599_v45  ;;  %v543_v50 = vpop.f32.mrf.mxu0 }
 0x145   : > { %v1232_v51 = vadd.f32 %v1148_v42, %v1138_v41  ;;  %v1157_v52 = vmul.f32 0.16666667, %v1077_v43  ;;  %v918_v53 = vmax.f32 %v838_v44, 0.0  ;;  %v847_v54 = vadd.f32 3.0, %v543_v50 }
 0x146   : > { %v1245_v56 = vadd.f32 %v1149_v47, %v1139_v46  ;;  %v919_v28 = vmax.f32 %v839_v48, 0.0 }
 0x147   : > { %v1220_v9 = vadd.f32 %v1219_v31, %v1157_v52  ;;  %v998_v57 = vmin.f32 %v918_v53, 6.0  ;;  %v927_v58 = vmax.f32 %v847_v54, 0.0 }
 0x148   : > { %v999_v59 = vmin.f32 %v919_v28, 6.0 }
 0x149   : > { %v1078_v60 = vmul.f32 %v998_v57, %v570_v40  ;;  %v1007_v61 = vmin.f32 %v927_v58, 6.0 }
 0x14a   : > { %v1079_v62 = vmul.f32 %v999_v59, %v599_v45  ;;  %v572_v63 = vpop.f32.mrf.mxu2 }
 0x14b   : > { %v1158_v0 = vmul.f32 0.16666667, %v1078_v60  ;;  %v1087_v1 = vmul.f32 %v1007_v61, %v543_v50  ;;  %v848_v2 = vadd.f32 3.0, %v572_v63  ;;  %v601_v3 = vpop.f32.mrf.mxu3 }
 0x14c   : > { %v1159_v4 = vmul.f32 0.16666667, %v1079_v62  ;;  %v849_v5 = vadd.f32 3.0, %v601_v3  ;;  %v546_v6 = vpop.f32.mrf.mxu0 }
 0x14d   : > { %v1233_v7 = vadd.f32 %v1232_v51, %v1158_v0  ;;  %v1167_v8 = vmul.f32 0.16666667, %v1087_v1  ;;  %v928_v10 = vmax.f32 %v848_v2, 0.0  ;;  %v857_v11 = vadd.f32 3.0, %v546_v6 }
 0x14e   : > { %v1246_v12 = vadd.f32 %v1245_v56, %v1159_v4  ;;  %v929_v13 = vmax.f32 %v849_v5, 0.0 }
 0x14f   : > { %v1221_v14 = vadd.f32 %v1220_v9, %v1167_v8  ;;  %v1008_v15 = vmin.f32 %v928_v10, 6.0  ;;  %v937_v16 = vmax.f32 %v857_v11, 0.0  ;;  %1727 = vmatmul.msk.bf16.gmra.mxu1 %vm514_vm1, %v1961_v34  ;;  %1731 = vmatmul.msk.bf16.gmra.mxu2 %vm514_vm1, %v1961_v34 }
 0x150   : > { %v1009_v17 = vmin.f32 %v929_v13, 6.0  ;;  %1735 = vmatmul.msk.bf16.gmra.mxu3 %vm514_vm1, %v1961_v34 }
 0x151   : > { %v1088_v18 = vmul.f32 %v1008_v15, %v572_v63  ;;  %v1017_v19 = vmin.f32 %v937_v16, 6.0 }
 0x152   : > { %v1089_v20 = vmul.f32 %v1009_v17, %v601_v3  ;;  %v575_v21 = vpop.f32.mrf.mxu2 }
 0x153   : > { %v1168_v22 = vmul.f32 0.16666667, %v1088_v18  ;;  %v1097_v49 = vmul.f32 %v1017_v19, %v546_v6  ;;  %v858_v23 = vadd.f32 3.0, %v575_v21  ;;  %v604_v24 = vpop.f32.mrf.mxu3 }
 0x154   : > { %v1169_v25 = vmul.f32 0.16666667, %v1089_v20  ;;  %v859_v26 = vadd.f32 3.0, %v604_v24  ;;  %v548_v27 = vpop.f32.mrf.mxu0 }
 0x155   : > { %v1234_v29 = vadd.f32 %v1233_v7, %v1168_v22  ;;  %v1177_v30 = vmul.f32 0.16666667, %v1097_v49  ;;  %v938_v31 = vmax.f32 %v858_v23, 0.0  ;;  %v867_v32 = vadd.f32 3.0, %v548_v27 }
 0x156   : > { %v1247_v33 = vadd.f32 %v1246_v12, %v1169_v25  ;;  %v939_v35 = vmax.f32 %v859_v26, 0.0 }
 0x157   : > { %v1222_v36 = vadd.f32 %v1221_v14, %v1177_v30  ;;  %v1018_v37 = vmin.f32 %v938_v31, 6.0  ;;  %v947_v34 = vmax.f32 %v867_v32, 0.0 }
 0x158   : > { %v1019_v38 = vmin.f32 %v939_v35, 6.0 }
 0x159   : > { %v1098_v39 = vmul.f32 %v1018_v37, %v575_v21  ;;  %v1027_v40 = vmin.f32 %v947_v34, 6.0 }
 0x15a   : > { %v1099_v41 = vmul.f32 %v1019_v38, %v604_v24  ;;  %v577_v42 = vpop.f32.mrf.mxu2 }
 0x15b   : > { %v1178_v43 = vmul.f32 0.16666667, %v1098_v39  ;;  %v1107_v44 = vmul.f32 %v1027_v40, %v548_v27  ;;  %v868_v45 = vadd.f32 3.0, %v577_v42  ;;  %v606_v46 = vpop.f32.mrf.mxu3 }
 0x15c   : > { %v1179_v47 = vmul.f32 0.16666667, %v1099_v41  ;;  %v869_v48 = vadd.f32 3.0, %v606_v46  ;;  %v551_v50 = vpop.f32.mrf.mxu1 }
 0x15d   : > { %v1235_v51 = vadd.f32 %v1234_v29, %v1178_v43  ;;  %v1187_v52 = vmul.f32 0.16666667, %v1107_v44  ;;  %v948_v53 = vmax.f32 %v868_v45, 0.0  ;;  %v877_v54 = vadd.f32 3.0, %v551_v50  ;;  %v2034_v37 = vpop.f32.mrf.mxu0 }
 0x15e   : > { %v1248_v56 = vadd.f32 %v1247_v33, %v1179_v47  ;;  %v949_v28 = vmax.f32 %v869_v48, 0.0 }
 0x15f   : > { %v1223_v9 = vadd.f32 %v1222_v36, %v1187_v52  ;;  %v1028_v57 = vmin.f32 %v948_v53, 6.0  ;;  %v957_v58 = vmax.f32 %v877_v54, 0.0  ;;  %1728 = vmatmul.msk.bf16.gmra.mxu1 %vm514_vm1, %v1970_v55  ;;  %1732 = vmatmul.msk.bf16.gmra.mxu2 %vm514_vm1, %v1970_v55 }
 0x160   : > { %v1029_v59 = vmin.f32 %v949_v28, 6.0  ;;  %1736 = vmatmul.msk.bf16.gmra.mxu3 %vm514_vm1, %v1970_v55  ;;  %vm2179_vm1 = vmor %vm1468_vm14, %vm2263_vm13  ;;  %vm1377_vm14 = vcmask 1045508   ;;  %vm1478_vm13 = vcmask 1045509  }
 0x161   : > { %v1108_v60 = vmul.f32 %v1028_v57, %v577_v42  ;;  %v1037_v61 = vmin.f32 %v957_v58, 6.0  ;;  %vm1473_vm12 = vmor %vm2183_vm7, %vm2179_vm1  ;;  %vm1483_vm7 = vsmask.f32 6400 }
 0x162   : > { %v1109_v62 = vmul.f32 %v1029_v59, %v606_v46  ;;  %v580_v63 = vpop.f32.mrf.mxu2 }
 0x163   : > { %v1188_v0 = vmul.f32 0.16666667, %v1108_v60  ;;  %v1117_v1 = vmul.f32 %v1037_v61, %v551_v50  ;;  %v878_v2 = vadd.f32 3.0, %v580_v63  ;;  %v609_v3 = vpop.f32.mrf.mxu3 }
 0x164   : > { %v1189_v4 = vmul.f32 0.16666667, %v1109_v62  ;;  %v879_v5 = vadd.f32 3.0, %v609_v3  ;;  %v553_v6 = vpop.f32.mrf.mxu1 }
 0x165   : > { %v1236_v7 = vadd.f32 %v1235_v51, %v1188_v0  ;;  %v1197_v8 = vmul.f32 0.16666667, %v1117_v1  ;;  %v958_v10 = vmax.f32 %v878_v2, 0.0  ;;  %v887_v11 = vadd.f32 3.0, %v553_v6  ;;  %v2038_v62 = vpop.f32.mrf.mxu0 }
 0x166   : > { %v1249_v12 = vadd.f32 %v1248_v56, %v1189_v4  ;;  %v959_v13 = vmax.f32 %v879_v5, 0.0 }
 0x167   : > { %v1224_v14 = vadd.f32 %v1223_v9, %v1197_v8  ;;  %v1038_v15 = vmin.f32 %v958_v10, 6.0  ;;  %v967_v55 = vmax.f32 %v887_v11, 0.0 }
 0x168   : > { %v1039_v16 = vmin.f32 %v959_v13, 6.0 }
 0x169   : > { %v1118_v17 = vmul.f32 %v1038_v15, %v580_v63  ;;  %v1047_v18 = vmin.f32 %v967_v55, 6.0 }
 0x16a   : > { %v1119_v19 = vmul.f32 %v1039_v16, %v609_v3  ;;  %v582_v20 = vpop.f32.mrf.mxu2 }
 0x16b   : > { %v1198_v21 = vmul.f32 0.16666667, %v1118_v17  ;;  %v1127_v22 = vmul.f32 %v1047_v18, %v553_v6  ;;  %v888_v49 = vadd.f32 3.0, %v582_v20  ;;  %v611_v23 = vpop.f32.mrf.mxu3 }
 0x16c   : > { %v1199_v24 = vmul.f32 0.16666667, %v1119_v19  ;;  %v889_v25 = vadd.f32 3.0, %v611_v23  ;;  %v623_v26 = vpop.f32.mrf.mxu1 }
 0x16d   : > { %v1237_v27 = vadd.f32 %v1236_v7, %v1198_v21  ;;  %v1207_v29 = vmul.f32 0.16666667, %v1127_v22  ;;  %v968_v30 = vmax.f32 %v888_v49, 0.0  ;;  %v820_v31 = vadd.f32 3.0, %v623_v26 }
 0x16e   : > { %v1250_v32 = vadd.f32 %v1249_v12, %v1199_v24  ;;  %v969_v33 = vmax.f32 %v889_v25, 0.0 }
 0x16f   : > { %v1225_v35 = vadd.f32 %v1224_v14, %v1207_v29  ;;  %v1048_v36 = vmin.f32 %v968_v30, 6.0  ;;  %v900_v40 = vmax.f32 %v820_v31, 0.0 }
 0x170   : > { %v1049_v34 = vmin.f32 %v969_v33, 6.0 }
 0x171   : > { %v1226_v38 = vrot.slane %v1225_v35, 4  ;;  %v1128_v39 = vmul.f32 %v1048_v36, %v582_v20  ;;  %v980_v52 = vmin.f32 %v900_v40, 6.0 }
 0x172   : > { %v1129_v41 = vmul.f32 %v1049_v34, %v611_v23  ;;  %v652_v42 = vpop.f32.mrf.mxu2 }
 0x173   : > { %v1227_v43 = vadd.f32 %v1226_v38, %v1225_v35  ;;  %v1208_v44 = vmul.f32 0.16666667, %v1128_v39  ;;  %v821_v45 = vadd.f32 3.0, %v652_v42  ;;  %v681_v46 = vpop.f32.mrf.mxu3  ;;  %v1060_v60 = vmul.f32 %v980_v52, %v623_v26  ;;  %v2040_v35 = vpop.f32.mrf.mxu0 }
 0x174   : > { %v1209_v47 = vmul.f32 0.16666667, %v1129_v41  ;;  %v822_v48 = vadd.f32 3.0, %v681_v46  ;;  %v625_v50 = vpop.f32.mrf.mxu1 }
 0x175   : > { %v1238_v51 = vadd.f32 %v1237_v27, %v1208_v44  ;;  %v1228_v53 = vrot.slane %v1227_v43, 2  ;;  %v901_v56 = vmax.f32 %v821_v45, 0.0  ;;  %v830_v28 = vadd.f32 3.0, %v625_v50 }
 0x176   : > { %v2036_v54 = vadd.f32 %v1250_v32, %v1209_v47  ;;  %v902_v57 = vmax.f32 %v822_v48, 0.0  ;;  %v1140_v10 = vmul.f32 0.16666667, %v1060_v60 }
 0x177   : > { %v1239_v9 = vrot.slane %v1238_v51, 4  ;;  %v910_v58 = vmax.f32 %v830_v28, 0.0  ;;  %v1229_v61 = vadd.f32 %v1228_v53, %v1227_v43  ;;  %v981_v63 = vmin.f32 %v901_v56, 6.0 }
 0x178   : > { %v982_v4 = vmin.f32 %v902_v57, 6.0 }
 0x179   : > { %v1240_v59 = vadd.f32 %v1239_v9, %v1238_v51  ;;  %v990_v0 = vmin.f32 %v910_v58, 6.0  ;;  %v1230_v13 = vrot.slane %v1229_v61, 1  ;;  %v1061_v14 = vmul.f32 %v981_v63, %v652_v42 }
 0x17a   : > { %v654_v1 = vpop.f32.mrf.mxu2  ;;  %v1062_v19 = vmul.f32 %v982_v4, %v681_v46 }
 0x17b   : > { %v1241_v2 = vrot.slane %v1240_v59, 2  ;;  %v683_v3 = vpop.f32.mrf.mxu3  ;;  %v1070_v5 = vmul.f32 %v990_v0, %v625_v50  ;;  %v831_v6 = vadd.f32 3.0, %v654_v1  ;;  %v1231_v24 = vadd.f32 %v1230_v13, %v1229_v61  ;;  %v2045_v4 = vpop.f32.mrf.mxu0 }
 0x17c   : > { %v628_v7 = vpop.f32.mrf.mxu1  ;;  %v832_v11 = vadd.f32 3.0, %v683_v3  ;;  %v1141_v25 = vmul.f32 0.16666667, %v1061_v14  ;;  %v1142_v36 = vmul.f32 0.16666667, %v1062_v19 }
 0x17d   : > { %v1242_v8 = vadd.f32 %v1241_v2, %v1240_v59  ;;  %v840_v12 = vadd.f32 3.0, %v628_v7  ;;  %v1150_v15 = vmul.f32 0.16666667, %v1070_v5  ;;  %v911_v55 = vmax.f32 %v831_v6, 0.0 }
 0x17e   : > { %v912_v17 = vmax.f32 %v832_v11, 0.0 }
 0x17f   : > { %v1243_v16 = vrot.slane %v1242_v8, 1  ;;  %v920_v18 = vmax.f32 %v840_v12, 0.0  ;;  %v1258_v20 = vadd.f32 %v1150_v15, %v1140_v10  ;;  %v991_v21 = vmin.f32 %v911_v55, 6.0 }
 0x180   : > { %v992_v49 = vmin.f32 %v912_v17, 6.0 }
 0x181   : > { %v1244_v22 = vadd.f32 %v1243_v16, %v1242_v8  ;;  %v1000_v23 = vmin.f32 %v920_v18, 6.0  ;;  %v1071_v26 = vmul.f32 %v991_v21, %v654_v1 }
 0x182   : > { %v657_v27 = vpop.f32.mrf.mxu2  ;;  %v1072_v30 = vmul.f32 %v992_v49, %v683_v3 }
 0x183   : > { %v1359_v29 = vrot.slane %v1244_v22, 7  ;;  %v1080_v31 = vmul.f32 %v1000_v23, %v628_v7  ;;  %v841_v32 = vadd.f32 3.0, %v657_v27  ;;  %v686_v33 = vpop.f32.mrf.mxu3  ;;  %v1151_v34 = vmul.f32 0.16666667, %v1071_v26 }
 0x184   : > { %v842_v38 = vadd.f32 3.0, %v686_v33  ;;  %v630_v39 = vpop.f32.mrf.mxu1  ;;  %v1152_v41 = vmul.f32 0.16666667, %v1072_v30 }
 0x185   : > { %v2043_v40 = vsel %vm1367_vm2, %v1231_v24, %v1359_v29  ;;  %v1160_v42 = vmul.f32 0.16666667, %v1080_v31  ;;  %v921_v43 = vmax.f32 %v841_v32, 0.0  ;;  %v1271_v44 = vadd.f32 %v1151_v34, %v1141_v25  ;;  %v2047_v32 = vpop.f32.mrf.mxu0 }
 0x186   : > { %v922_v45 = vmax.f32 %v842_v38, 0.0  ;;  %v850_v46 = vadd.f32 3.0, %v630_v39  ;;  %v1284_v47 = vadd.f32 %v1152_v41, %v1142_v36 }
 0x187   : > { %v1259_v48 = vadd.f32 %v1258_v20, %v1160_v42  ;;  %v1001_v50 = vmin.f32 %v921_v43, 6.0 }
 0x188   : > { %v1002_v51 = vmin.f32 %v922_v45, 6.0  ;;  %v930_v52 = vmax.f32 %v850_v46, 0.0 }
 0x189   : > { %v1081_v53 = vmul.f32 %v1001_v50, %v657_v27 }
 0x18a   : > { %v1082_v56 = vmul.f32 %v1002_v51, %v686_v33  ;;  %v1010_v28 = vmin.f32 %v930_v52, 6.0  ;;  %v659_v9 = vpop.f32.mrf.mxu2 }
 0x18b   : > { %v1161_v57 = vmul.f32 0.16666667, %v1081_v53  ;;  %v851_v58 = vadd.f32 3.0, %v659_v9  ;;  %v688_v59 = vpop.f32.mrf.mxu3 }
 0x18c   : > { %v1162_v60 = vmul.f32 0.16666667, %v1082_v56  ;;  %v1090_v61 = vmul.f32 %v1010_v28, %v630_v39  ;;  %v852_v63 = vadd.f32 3.0, %v688_v59  ;;  %v633_v0 = vpop.f32.mrf.mxu1 }
 0x18d   : > { %v1272_v1 = vadd.f32 %v1271_v44, %v1161_v57  ;;  %v931_v2 = vmax.f32 %v851_v58, 0.0  ;;  %v860_v3 = vadd.f32 3.0, %v633_v0 }
 0x18e   : > { %v1285_v5 = vadd.f32 %v1284_v47, %v1162_v60  ;;  %v1170_v6 = vmul.f32 0.16666667, %v1090_v61  ;;  %v932_v7 = vmax.f32 %v852_v63, 0.0  ;;  %v2049_v61 = vpop.f32.mrf.mxu0 }
 0x18f   : > { %v1011_v8 = vmin.f32 %v931_v2, 6.0  ;;  %v940_v10 = vmax.f32 %v860_v3, 0.0 }
 0x190   : > { %v1260_v11 = vadd.f32 %v1259_v48, %v1170_v6  ;;  %v1012_v12 = vmin.f32 %v932_v7, 6.0  ;;  %v1252_v6 = vrot.slane %v2036_v54, 4 }
 0x191   : > { %v1091_v13 = vmul.f32 %v1011_v8, %v659_v9  ;;  %v1020_v14 = vmin.f32 %v940_v10, 6.0 }
 0x192   : > { %v1092_v15 = vmul.f32 %v1012_v12, %v688_v59  ;;  %v662_v55 = vpop.f32.mrf.mxu2 }
 0x193   : > { %v1171_v16 = vmul.f32 0.16666667, %v1091_v13  ;;  %v1100_v17 = vmul.f32 %v1020_v14, %v633_v0  ;;  %v861_v18 = vadd.f32 3.0, %v662_v55  ;;  %v691_v19 = vpop.f32.mrf.mxu3 }
 0x194   : > { %v1172_v20 = vmul.f32 0.16666667, %v1092_v15  ;;  %v862_v21 = vadd.f32 3.0, %v691_v19  ;;  %v635_v22 = vpop.f32.mrf.mxu1 }
 0x195   : > { %v1273_v49 = vadd.f32 %v1272_v1, %v1171_v16  ;;  %v1180_v23 = vmul.f32 0.16666667, %v1100_v17  ;;  %v941_v24 = vmax.f32 %v861_v18, 0.0  ;;  %v870_v25 = vadd.f32 3.0, %v635_v22 }
 0x196   : > { %v1286_v26 = vadd.f32 %v1285_v5, %v1172_v20  ;;  %v942_v27 = vmax.f32 %v862_v21, 0.0  ;;  %v833_v21 = vadd.f32 3.0, %v2038_v62 }
 0x197   : > { %v1261_v29 = vadd.f32 %v1260_v11, %v1180_v23  ;;  %v1021_v30 = vmin.f32 %v941_v24, 6.0  ;;  %v950_v31 = vmax.f32 %v870_v25, 0.0 }
 0x198   : > { %v1022_v33 = vmin.f32 %v942_v27, 6.0 }
 0x199   : > { %v1101_v36 = vmul.f32 %v1021_v30, %v662_v55  ;;  %v1030_v34 = vmin.f32 %v950_v31, 6.0  ;;  %v823_v30 = vadd.f32 3.0, %v2034_v37 }
 0x19a   : > { %v1102_v38 = vmul.f32 %v1022_v33, %v691_v19  ;;  %v664_v39 = vpop.f32.mrf.mxu2  ;;  %v1253_v19 = vadd.f32 %v1252_v6, %v2036_v54  ;;  %v2055_v33 = vpop.f32.mrf.mxu0  ;;  %v913_v54 = vmax.f32 %v833_v21, 0.0 }
 0x19b   : > { %v1181_v41 = vmul.f32 0.16666667, %v1101_v36  ;;  %v1110_v42 = vmul.f32 %v1030_v34, %v635_v22  ;;  %v871_v43 = vadd.f32 3.0, %v664_v39  ;;  %v693_v44 = vpop.f32.mrf.mxu3 }
 0x19c   : > { %v1182_v45 = vmul.f32 0.16666667, %v1102_v38  ;;  %v872_v46 = vadd.f32 3.0, %v693_v44  ;;  %v638_v47 = vpop.f32.mrf.mxu1  ;;  %v1254_v31 = vrot.slane %v1253_v19, 2 }
 0x19d   : > { %v1274_v48 = vadd.f32 %v1273_v49, %v1181_v41  ;;  %v1190_v50 = vmul.f32 0.16666667, %v1110_v42  ;;  %v951_v51 = vmax.f32 %v871_v43, 0.0  ;;  %v880_v52 = vadd.f32 3.0, %v638_v47 }
 0x19e   : > { %v1287_v53 = vadd.f32 %v1286_v26, %v1182_v45  ;;  %v952_v56 = vmax.f32 %v872_v46, 0.0  ;;  %v843_v43 = vadd.f32 3.0, %v2040_v35 }
 0x19f   : > { %v1262_v28 = vadd.f32 %v1261_v29, %v1190_v50  ;;  %v1031_v9 = vmin.f32 %v951_v51, 6.0  ;;  %v960_v57 = vmax.f32 %v880_v52, 0.0  ;;  %v1255_v50 = vadd.f32 %v1254_v31, %v1253_v19 }
 0x1a0   : > { %v1032_v58 = vmin.f32 %v952_v56, 6.0  ;;  %v903_v52 = vmax.f32 %v823_v30, 0.0 }
 0x1a1   : > { %v1111_v59 = vmul.f32 %v1031_v9, %v664_v39  ;;  %v1040_v60 = vmin.f32 %v960_v57, 6.0  ;;  %v923_v9 = vmax.f32 %v843_v43, 0.0 }
 0x1a2   : > { %v1112_v63 = vmul.f32 %v1032_v58, %v693_v44  ;;  %v667_v0 = vpop.f32.mrf.mxu2  ;;  %v853_v44 = vadd.f32 3.0, %v2045_v4 }
 0x1a3   : > { %v1191_v1 = vmul.f32 0.16666667, %v1111_v59  ;;  %v1120_v2 = vmul.f32 %v1040_v60, %v638_v47  ;;  %v881_v3 = vadd.f32 3.0, %v667_v0  ;;  %v696_v5 = vpop.f32.mrf.mxu3  ;;  %v863_v60 = vadd.f32 3.0, %v2047_v32 }
 0x1a4   : > { %v1192_v7 = vmul.f32 0.16666667, %v1112_v63  ;;  %v882_v8 = vadd.f32 3.0, %v696_v5  ;;  %v640_v10 = vpop.f32.mrf.mxu1  ;;  %v933_v57 = vmax.f32 %v853_v44, 0.0 }
 0x1a5   : > { %v1275_v11 = vadd.f32 %v1274_v48, %v1191_v1  ;;  %v1200_v12 = vmul.f32 0.16666667, %v1120_v2  ;;  %v961_v13 = vmax.f32 %v881_v3, 0.0  ;;  %v890_v14 = vadd.f32 3.0, %v640_v10 }
 0x1a6   : > { %v1288_v15 = vadd.f32 %v1287_v53, %v1192_v7  ;;  %v962_v55 = vmax.f32 %v882_v8, 0.0  ;;  %v1256_v2 = vrot.slane %v1255_v50, 1  ;;  %v873_v3 = vadd.f32 3.0, %v2049_v61 }
 0x1a7   : > { %v1263_v16 = vadd.f32 %v1262_v28, %v1200_v12  ;;  %v1041_v17 = vmin.f32 %v961_v13, 6.0  ;;  %v970_v18 = vmax.f32 %v890_v14, 0.0  ;;  %v993_v28 = vmin.f32 %v913_v54, 6.0  ;;  %v727_v14 = vpop.f32.mrf.mxu0 }
 0x1a8   : > { %v1042_v20 = vmin.f32 %v962_v55, 6.0  ;;  %v983_v7 = vmin.f32 %v903_v52, 6.0  ;;  %v1003_v12 = vmin.f32 %v923_v9, 6.0  ;;  %v1013_v13 = vmin.f32 %v933_v57, 6.0 }
 0x1a9   : > { %v1121_v22 = vmul.f32 %v1041_v17, %v667_v0  ;;  %v1050_v49 = vmin.f32 %v970_v18, 6.0  ;;  %v943_v55 = vmax.f32 %v863_v60, 0.0  ;;  %v1257_v19 = vadd.f32 %v1256_v2, %v1255_v50 }
 0x1aa   : > { %v1122_v23 = vmul.f32 %v1042_v20, %v696_v5  ;;  %v669_v24 = vpop.f32.mrf.mxu2  ;;  %v953_v20 = vmax.f32 %v873_v3, 0.0 }
 0x1ab   : > { %v1201_v25 = vmul.f32 0.16666667, %v1121_v22  ;;  %v1130_v26 = vmul.f32 %v1050_v49, %v640_v10  ;;  %v891_v27 = vadd.f32 3.0, %v669_v24  ;;  %v698_v29 = vpop.f32.mrf.mxu3  ;;  %v1063_v22 = vmul.f32 %v983_v7, %v2034_v37 }
 0x1ac   : > { %v1202_v36 = vmul.f32 0.16666667, %v1122_v23  ;;  %v892_v34 = vadd.f32 3.0, %v698_v29  ;;  %v2057_v38 = vpop.f32.mrf.mxu1  ;;  %v893_v49 = vadd.f32 3.0, %v727_v14  ;;  %v1023_v30 = vmin.f32 %v943_v55, 6.0 }
 0x1ad   : > { %v1276_v39 = vadd.f32 %v1275_v11, %v1201_v25  ;;  %v1210_v41 = vmul.f32 0.16666667, %v1130_v26  ;;  %v971_v42 = vmax.f32 %v891_v27, 0.0  ;;  %v1073_v11 = vmul.f32 %v993_v28, %v2038_v62 }
 0x1ae   : > { %v1289_v45 = vadd.f32 %v1288_v15, %v1202_v36  ;;  %v972_v46 = vmax.f32 %v892_v34, 0.0  ;;  %v1083_v62 = vmul.f32 %v1003_v12, %v2040_v35  ;;  %v1093_v26 = vmul.f32 %v1013_v13, %v2045_v4 }
 0x1af   : > { %v1264_v47 = vadd.f32 %v1263_v16, %v1210_v41  ;;  %v1051_v48 = vmin.f32 %v971_v42, 6.0  ;;  %v883_v16 = vadd.f32 3.0, %v2055_v33  ;;  %v1153_v25 = vmul.f32 0.16666667, %v1073_v11 }
 0x1b0   : > { %v1052_v51 = vmin.f32 %v972_v46, 6.0  ;;  %v1033_v41 = vmin.f32 %v953_v20, 6.0  ;;  %v973_v43 = vmax.f32 %v893_v49, 0.0  ;;  %v1143_v4 = vmul.f32 0.16666667, %v1063_v22 }
 0x1b1   : > { %v1265_v53 = vrot.slane %v1264_v47, 4  ;;  %v1131_v56 = vmul.f32 %v1051_v48, %v669_v24  ;;  %v963_v31 = vmax.f32 %v883_v16, 0.0  ;;  %v1173_v28 = vmul.f32 0.16666667, %v1093_v26 }
 0x1b2   : > { %v1132_v58 = vmul.f32 %v1052_v51, %v698_v29  ;;  %v2061_v59 = vpop.f32.mrf.mxu2  ;;  %v1297_v52 = vadd.f32 %v1153_v25, %v1143_v4  ;;  %v1113_v9 = vmul.f32 %v1033_v41, %v2049_v61  ;;  %v1053_v57 = vmin.f32 %v973_v43, 6.0 }
 0x1b3   : > { %v1266_v63 = vadd.f32 %v1265_v53, %v1264_v47  ;;  %v1211_v0 = vmul.f32 0.16666667, %v1131_v56  ;;  %v2064_v1 = vpop.f32.mrf.mxu3  ;;  %v1103_v47 = vmul.f32 %v1023_v30, %v2047_v32  ;;  %v1043_v48 = vmin.f32 %v963_v31, 6.0 }
 0x1b4   : > { %v1212_v5 = vmul.f32 0.16666667, %v1132_v58  ;;  %v2067_v6 = vpop.f32.mrf.mxu1  ;;  %v1133_v11 = vmul.f32 %v1053_v57, %v727_v14 }
 0x1b5   : > { %v1267_v8 = vrot.slane %v1266_v63, 2  ;;  %v1277_v10 = vadd.f32 %v1276_v39, %v1211_v0  ;;  %v1360_v39 = vrot.slane %v1257_v19, 6  ;;  %v1183_v32 = vmul.f32 0.16666667, %v1103_v47 }
 0x1b6   : > { %v1290_v15 = vadd.f32 %v1289_v45, %v1212_v5  ;;  %v1163_v45 = vmul.f32 0.16666667, %v1083_v62  ;;  %v1123_v2 = vmul.f32 %v1043_v48, %v2055_v33  ;;  %v834_v12 = vadd.f32 3.0, %v2067_v6 }
 0x1b7   : > { %v1268_v17 = vadd.f32 %v1267_v8, %v1266_v63  ;;  %v1278_v18 = vrot.slane %v1277_v10, 4  ;;  %v824_v33 = vadd.f32 3.0, %v2057_v38  ;;  %v826_v19 = vadd.f32 3.0, %v2064_v1 }
 0x1b8   : > { %v1291_v21 = vrot.slane %v1290_v15, 4  ;;  %v1298_v60 = vadd.f32 %v1297_v52, %v1163_v45  ;;  %v914_v20 = vmax.f32 %v834_v12, 0.0 }
 0x1b9   : > { %v1269_v23 = vrot.slane %v1268_v17, 1  ;;  %v1279_v24 = vadd.f32 %v1278_v18, %v1277_v10  ;;  %v1193_v10 = vmul.f32 0.16666667, %v1113_v9  ;;  %v825_v18 = vadd.f32 3.0, %v2061_v59 }
 0x1ba   : > { %v1292_v27 = vadd.f32 %v1291_v21, %v1290_v15  ;;  %v2074_v29 = vpop.f32.mrf.mxu2  ;;  %v1299_v8 = vadd.f32 %v1298_v60, %v1173_v28  ;;  %v1203_v15 = vmul.f32 0.16666667, %v1123_v2  ;;  %v906_v30 = vmax.f32 %v826_v19, 0.0 }
 0x1bb   : > { %v1270_v36 = vadd.f32 %v1269_v23, %v1268_v17  ;;  %v1280_v34 = vrot.slane %v1279_v24, 2  ;;  %v2076_v54 = vpop.f32.mrf.mxu3  ;;  %v835_v55 = vadd.f32 3.0, %v2074_v29  ;;  %v1213_v17 = vmul.f32 0.16666667, %v1133_v11 }
 0x1bc   : > { %v1293_v37 = vrot.slane %v1292_v27, 2  ;;  %v2078_v42 = vpop.f32.mrf.mxu1  ;;  %v1300_v13 = vadd.f32 %v1299_v8, %v1183_v32  ;;  %v836_v14 = vadd.f32 3.0, %v2076_v54  ;;  %v994_v31 = vmin.f32 %v914_v20, 6.0 }
 0x1bd   : > { %v1361_v44 = vrot.slane %v1270_v36, 5  ;;  %v1281_v35 = vadd.f32 %v1280_v34, %v1279_v24  ;;  %v915_v49 = vmax.f32 %v835_v55, 0.0  ;;  %v904_v24 = vmax.f32 %v824_v33, 0.0 }
 0x1be   : > { %v1294_v46 = vadd.f32 %v1293_v37, %v1292_v27  ;;  %v1301_v16 = vadd.f32 %v1300_v13, %v1193_v10  ;;  %v844_v25 = vadd.f32 3.0, %v2078_v42  ;;  %v905_v27 = vmax.f32 %v825_v18, 0.0 }
 0x1bf   : > { %v1370_v50 = vsel %vm2265_vm3, %v1360_v39, %v1361_v44  ;;  %v1282_v51 = vrot.slane %v1281_v35, 1  ;;  %v916_v36 = vmax.f32 %v836_v14, 0.0  ;;  %v995_v34 = vmin.f32 %v915_v49, 6.0  ;;  %vm2195_vm3 = vmor %vm1476_vm15, %vm1473_vm12 }
 0x1c0   : > { %v2084_v53 = vsel %vm2264_vm4, %v2043_v40, %v1370_v50  ;;  %v1295_v56 = vrot.slane %v1294_v46, 1  ;;  %v1302_v22 = vadd.f32 %v1301_v16, %v1203_v15  ;;  %v984_v39 = vmin.f32 %v904_v24, 6.0 }
 0x1c1   : > { %v1283_v58 = vadd.f32 %v1282_v51, %v1281_v35  ;;  %v924_v41 = vmax.f32 %v844_v25, 0.0  ;;  %v985_v43 = vmin.f32 %v905_v27, 6.0  ;;  %v986_v35 = vmin.f32 %v906_v30, 6.0 }
 0x1c2   : > { %v1296_v63 = vadd.f32 %v1295_v56, %v1294_v46  ;;  %v2087_v0 = vpop.f32.mrf.mxu2  ;;  %v1303_v26 = vadd.f32 %v1302_v22, %v1213_v17  ;;  %v1074_v4 = vmul.f32 %v994_v31, %v2067_v6  ;;  %v996_v45 = vmin.f32 %v916_v36, 6.0 }
 0x1c3   : > { %v1362_v3 = vrot.slane %v1283_v58, 4  ;;  %v2090_v5 = vpop.f32.mrf.mxu3  ;;  %v845_v44 = vadd.f32 3.0, %v2087_v0  ;;  %v1075_v47 = vmul.f32 %v995_v34, %v2074_v29  ;;  %v1064_v52 = vmul.f32 %v984_v39, %v2057_v38 }
 0x1c4   : > { %v1363_v7 = vrot.slane %v1296_v63, 3  ;;  %v2092_v40 = vpop.f32.mrf.mxu1  ;;  %v1304_v37 = vrot.slane %v1303_v26, 4  ;;  %v846_v48 = vadd.f32 3.0, %v2090_v5  ;;  %v1004_v56 = vmin.f32 %v924_v41, 6.0 }
 0x1c5   : > { %v854_v50 = vadd.f32 3.0, %v2092_v40  ;;  %v1065_v6 = vmul.f32 %v985_v43, %v2061_v59  ;;  %v925_v58 = vmax.f32 %v845_v44, 0.0  ;;  %v1066_v60 = vmul.f32 %v986_v35, %v2064_v1 }
 0x1c6   : > { %v2095_v61 = vsel %vm1373_vm5, %v1362_v3, %v1363_v7  ;;  %v2121_v57 = vadd.f32 %v1304_v37, %v1303_v26  ;;  %v1154_v29 = vmul.f32 0.16666667, %v1074_v4  ;;  %v1076_v63 = vmul.f32 %v996_v45, %v2076_v54 }
 0x1c7   : > { %v1155_v32 = vmul.f32 0.16666667, %v1075_v47  ;;  %v926_v2 = vmax.f32 %v846_v48, 0.0  ;;  %v934_v3 = vmax.f32 %v854_v50, 0.0  ;;  %v1144_v8 = vmul.f32 0.16666667, %v1064_v52 }
 0x1c8   : > { %v1084_v38 = vmul.f32 %v1004_v56, %v2078_v42  ;;  %v1306_v12 = vrot.slane %v2121_v57, 2  ;;  %v1145_v13 = vmul.f32 0.16666667, %v1065_v6  ;;  %v1005_v59 = vmin.f32 %v925_v58, 6.0 }
 0x1c9   : > { %v1146_v1 = vmul.f32 0.16666667, %v1066_v60  ;;  %v1310_v55 = vadd.f32 %v1154_v29, %v1144_v8  ;;  %v1156_v33 = vmul.f32 0.16666667, %v1076_v63  ;;  %v1006_v18 = vmin.f32 %v926_v2, 6.0 }
 0x1ca   : > { %v2103_v21 = vpop.f32.mrf.mxu2  ;;  %v1323_v17 = vadd.f32 %v1155_v32, %v1145_v13  ;;  %v1014_v19 = vmin.f32 %v934_v3, 6.0  ;;  %v1164_v14 = vmul.f32 0.16666667, %v1084_v38  ;;  %v1085_v26 = vmul.f32 %v1005_v59, %v2087_v0 }
 0x1cb   : > { %v2105_v23 = vpop.f32.mrf.mxu3  ;;  %v855_v10 = vadd.f32 3.0, %v2103_v21  ;;  %v247_v39 = vlaneseq  ;;  %v1086_v41 = vmul.f32 %v1006_v18, %v2090_v5  ;;  %v1336_v47 = vadd.f32 %v1156_v33, %v1146_v1 }
 0x1cc   : > { %v2108_v62 = vpop.f32.mrf.mxu1  ;;  %v856_v15 = vadd.f32 3.0, %v2105_v23  ;;  %v1094_v37 = vmul.f32 %v1014_v19, %v2092_v40  ;;  %v1311_v48 = vadd.f32 %v1310_v55, %v1164_v14  ;;  %v1870_v56 = vmov 0.0  }
 0x1cd   : > { %v864_v28 = vadd.f32 3.0, %v2108_v62  ;;  %v935_v22 = vmax.f32 %v855_v10, 0.0  ;;  %vm2142_vm6 = vcmp.lt.s32.totalorder %v247_v39, 256  ;;  %v1165_v5 = vmul.f32 0.16666667, %v1085_v26 }
 0x1ce   : > { %v936_v27 = vmax.f32 %v856_v15, 0.0  ;;  %251 = vst.msk [vmem:[#allocation2 + $0x8] sm:$0x3] %vm2142_vm6, %v1870_v56  ;;  %v1166_v60 = vmul.f32 0.16666667, %v1086_v41  ;;  %vm1486_vm12 = vcmask 1047559  }
 0x1cf   : > { %v944_v11 = vmax.f32 %v864_v28, 0.0  ;;  %v1015_v35 = vmin.f32 %v935_v22, 6.0  ;;  %v1324_v19 = vadd.f32 %v1323_v17, %v1165_v5  ;;  %vm1479_vm4 = vsmask.f32 5376 }
 0x1d0   : > { %v1016_v40 = vmin.f32 %v936_v27, 6.0  ;;  %vm2201_vm1 = vmand %vm1478_vm13, %vm1479_vm4  ;;  %vm1487_vm15 = vsmask.f32 7424 }
 0x1d1   : > { %v1024_v49 = vmin.f32 %v944_v11, 6.0  ;;  %v1095_v2 = vmul.f32 %v1015_v35, %v2103_v21  ;;  %vm1481_vm8 = vmor %vm2201_vm1, %vm2195_vm3  ;;  %vm2284_vm3 = vcmask 1042434   ;;  %vm2285_vm1 = vcmask 1041408  }
 0x1d2   : > { %v2112_v46 = vpop.f32.mrf.mxu2  ;;  %v1096_v15 = vmul.f32 %v1016_v40, %v2105_v23  ;;  %v1337_v23 = vadd.f32 %v1336_v47, %v1166_v60  ;;  %vm1484_vm4 = vmand %vm1375_vm9, %vm1483_vm7 }
 0x1d3   : > { %v2117_v51 = vpop.f32.mrf.mxu3  ;;  %v865_v54 = vadd.f32 3.0, %v2112_v46  ;;  %v1104_v4 = vmul.f32 %v1024_v49, %v2108_v62  ;;  %v1174_v62 = vmul.f32 0.16666667, %v1094_v37  ;;  %vm2217_vm13 = vmor %vm1484_vm4, %vm1481_vm8 }
 0x1d4   : > { %v751_v9 = vpop.f32.mrf.mxu1  ;;  %v866_v24 = vadd.f32 3.0, %v2117_v51  ;;  %v1176_v27 = vmul.f32 0.16666667, %v1096_v15  ;;  %vm2226_vm7 = vmand %vm1486_vm12, %vm1487_vm15 }
 0x1d5   : > { %v874_v7 = vadd.f32 3.0, %v751_v9  ;;  %v945_v36 = vmax.f32 %v865_v54, 0.0  ;;  %v1184_v3 = vmul.f32 0.16666667, %v1104_v4  ;;  %vm1489_vm8 = vmor %vm2226_vm7, %vm2217_vm13 }
 0x1d6   : > { %v946_v45 = vmax.f32 %v866_v24, 0.0  ;;  %v1338_v47 = vadd.f32 %v1337_v23, %v1176_v27 }
 0x1d7   : > { %v954_v42 = vmax.f32 %v874_v7, 0.0  ;;  %v1025_v28 = vmin.f32 %v945_v36, 6.0 }
 0x1d8   : > { %v1026_v7 = vmin.f32 %v946_v45, 6.0 }
 0x1d9   : > { %v1034_v43 = vmin.f32 %v954_v42, 6.0  ;;  %v1105_v1 = vmul.f32 %v1025_v28, %v2112_v46  ;;  %v1175_v42 = vmul.f32 0.16666667, %v1095_v2 }
 0x1da   : > { %v2131_v16 = vpop.f32.mrf.mxu2  ;;  %v1106_v14 = vmul.f32 %v1026_v7, %v2117_v51 }
 0x1db   : > { %v2133_v20 = vpop.f32.mrf.mxu3  ;;  %v875_v30 = vadd.f32 3.0, %v2131_v16  ;;  %v1114_v29 = vmul.f32 %v1034_v43, %v751_v9  ;;  %v1312_v9 = vadd.f32 %v1311_v48, %v1174_v62  ;;  %v1185_v46 = vmul.f32 0.16666667, %v1105_v1 }
 0x1dc   : > { %v754_v25 = vpop.f32.mrf.mxu1  ;;  %v876_v34 = vadd.f32 3.0, %v2133_v20  ;;  %v1325_v37 = vadd.f32 %v1324_v19, %v1175_v42  ;;  %v1186_v43 = vmul.f32 0.16666667, %v1106_v14 }
 0x1dd   : > { %v884_v31 = vadd.f32 3.0, %v754_v25  ;;  %v955_v50 = vmax.f32 %v875_v30, 0.0  ;;  %v1194_v54 = vmul.f32 0.16666667, %v1114_v29  ;;  %v1313_v49 = vadd.f32 %v1312_v9, %v1184_v3 }
 0x1de   : > { %v956_v6 = vmax.f32 %v876_v34, 0.0  ;;  %v1339_v40 = vadd.f32 %v1338_v47, %v1186_v43 }
 0x1df   : > { %v964_v44 = vmax.f32 %v884_v31, 0.0  ;;  %v1035_v10 = vmin.f32 %v955_v50, 6.0  ;;  %v1314_v36 = vadd.f32 %v1313_v49, %v1194_v54 }
 0x1e0   : > { %v1036_v55 = vmin.f32 %v956_v6, 6.0 }
 0x1e1   : > { %v1044_v52 = vmin.f32 %v964_v44, 6.0  ;;  %v1115_v24 = vmul.f32 %v1035_v10, %v2131_v16 }
 0x1e2   : > { %v783_v58 = vpop.f32.mrf.mxu2  ;;  %v1116_v30 = vmul.f32 %v1036_v55, %v2133_v20 }
 0x1e3   : > { %v885_v63 = vadd.f32 3.0, %v783_v58  ;;  %v812_v32 = vpop.f32.mrf.mxu3  ;;  %v1124_v11 = vmul.f32 %v1044_v52, %v754_v25  ;;  %v1195_v35 = vmul.f32 0.16666667, %v1115_v24  ;;  %v1326_v52 = vadd.f32 %v1325_v37, %v1185_v46 }
 0x1e4   : > { %v886_v8 = vadd.f32 3.0, %v812_v32  ;;  %v756_v38 = vpop.f32.mrf.mxu1  ;;  %v1196_v48 = vmul.f32 0.16666667, %v1116_v30 }
 0x1e5   : > { %v965_v13 = vmax.f32 %v885_v63, 0.0  ;;  %v894_v59 = vadd.f32 3.0, %v756_v38  ;;  %v1204_v25 = vmul.f32 0.16666667, %v1124_v11  ;;  %v1327_v62 = vadd.f32 %v1326_v52, %v1195_v35 }
 0x1e6   : > { %v966_v33 = vmax.f32 %v886_v8, 0.0  ;;  %v1340_v2 = vadd.f32 %v1339_v40, %v1196_v48 }
 0x1e7   : > { %v1045_v18 = vmin.f32 %v965_v13, 6.0  ;;  %v974_v21 = vmax.f32 %v894_v59, 0.0  ;;  %v1315_v4 = vadd.f32 %v1314_v36, %v1204_v25 }
 0x1e8   : > { %v1046_v22 = vmin.f32 %v966_v33, 6.0 }
 0x1e9   : > { %v1054_v26 = vmin.f32 %v974_v21, 6.0  ;;  %v1125_v34 = vmul.f32 %v1045_v18, %v783_v58  ;;  %v1307_v58 = vadd.f32 %v1306_v12, %v2121_v57 }
 0x1ea   : > { %v785_v31 = vpop.f32.mrf.mxu2  ;;  %v1126_v51 = vmul.f32 %v1046_v22, %v812_v32 }
 0x1eb   : > { %v1134_v39 = vmul.f32 %v1054_v26, %v756_v38  ;;  %v895_v41 = vadd.f32 3.0, %v785_v31  ;;  %v814_v17 = vpop.f32.mrf.mxu3  ;;  %v1205_v20 = vmul.f32 0.16666667, %v1125_v34  ;;  %v1308_v10 = vrot.slane %v1307_v58, 1 }
 0x1ec   : > { %v896_v44 = vadd.f32 3.0, %v814_v17  ;;  %v1206_v28 = vmul.f32 0.16666667, %v1126_v51 }
 0x1ed   : > { %v1214_v16 = vmul.f32 0.16666667, %v1134_v39  ;;  %v975_v45 = vmax.f32 %v895_v41, 0.0  ;;  %v1328_v7 = vadd.f32 %v1327_v62, %v1205_v20  ;;  %v1309_v33 = vadd.f32 %v1308_v10, %v1307_v58 }
 0x1ee   : > { %v976_v50 = vmax.f32 %v896_v44, 0.0  ;;  %v1341_v8 = vadd.f32 %v1340_v2, %v1206_v28  ;;  %v1218_v44 = vld [vmem:[#allocation2 + $0x8] sm:$0x3] }
 0x1ef   : > { %v1316_v56 = vadd.f32 %v1315_v4, %v1214_v16  ;;  %v1055_v5 = vmin.f32 %v975_v45, 6.0  ;;  %v1364_v49 = vrot.slane %v1309_v33, 2  ;;  %v1493_v33 = vld [vmem:[%s240_s18 + $0x8] sm:$0x3] }
 0x1f0   : > { %v1056_v6 = vmin.f32 %v976_v50, 6.0 }
 0x1f1   : > { %v1317_v29 = vrot.slane %v1316_v56, 4  ;;  %v1135_v63 = vmul.f32 %v1055_v5, %v785_v31 }
 0x1f2   : > { %v1136_v3 = vmul.f32 %v1056_v6, %v814_v17 }
 0x1f3   : > { %v1318_v57 = vadd.f32 %v1317_v29, %v1316_v56  ;;  %v1215_v12 = vmul.f32 0.16666667, %v1135_v63 }
 0x1f4   : > { %v1216_v38 = vmul.f32 0.16666667, %v1136_v3 }
 0x1f5   : > { %v1319_v11 = vrot.slane %v1318_v57, 2  ;;  %v1329_v13 = vadd.f32 %v1328_v7, %v1215_v12 }
 0x1f6   : > { %v1342_v59 = vadd.f32 %v1341_v8, %v1216_v38  ;;  %v1490_v38 = vld [vmem:[%s240_s18] sm:$0xff] }
 0x1f7   : > { %v1320_v15 = vadd.f32 %v1319_v11, %v1318_v57  ;;  %v1330_v1 = vrot.slane %v1329_v13, 4 }
 0x1f8   : > { %v1343_v55 = vrot.slane %v1342_v59, 4 }
 0x1f9   : > { %v1321_v54 = vrot.slane %v1320_v15, 1  ;;  %v1331_v18 = vadd.f32 %v1330_v1, %v1329_v13 }
 0x1fa   : > { %v1344_v19 = vadd.f32 %v1343_v55, %v1342_v59 }
 0x1fb   : > { %v1322_v42 = vadd.f32 %v1321_v54, %v1320_v15  ;;  %v1332_v14 = vrot.slane %v1331_v18, 2 }
 0x1fc   : > { %v1345_v22 = vrot.slane %v1344_v19, 2 }
 0x1fd   : > { %v1365_v24 = vrot.slane %v1322_v42, 1  ;;  %v1333_v25 = vadd.f32 %v1332_v14, %v1331_v18 }
 0x1fe   : > { %v1346_v26 = vadd.f32 %v1345_v22, %v1344_v19 }
 0x1ff   : > { %v1376_v23 = vsel %vm1375_vm9, %v1364_v49, %v1365_v24  ;;  %v1334_v36 = vrot.slane %v1333_v25, 1 }
 0x200   : > { %v1378_v27 = vsel %vm1377_vm14, %v2095_v61, %v1376_v23  ;;  %v1347_v46 = vrot.slane %v1346_v26, 1 }
 0x201   : > { %v1380_v31 = vsel %vm1379_vm0, %v2084_v53, %v1378_v27  ;;  %v1335_v61 = vadd.f32 %v1334_v36, %v1333_v25 }
 0x202   : > { %v1348_v39 = vadd.f32 %v1347_v46, %v1346_v26  ;;  %v1397_v41 = vmul.f32 0.015625, %v1380_v31 }
 0x204   : > { %v1366_v17 = vrot.slane %v1348_v39, 7  ;;  %v1401_v37 = vperm.slane %v1397_v41, 0  ;;  %v1402_v53 = vperm.slane %v1397_v41, 1  ;;  %v1403_v43 = vperm.slane %v1397_v41, 2 }
 0x205   : > { %v1404_v51 = vperm.slane %v1397_v41, 3  ;;  %v1405_v35 = vperm.slane %v1397_v41, 4  ;;  %v1406_v4 = vperm.slane %v1397_v41, 5  ;;  %v1407_v16 = vperm.slane %v1397_v41, 6 }
 0x206   : > { %v1408_v45 = vperm.slane %v1397_v41, 7  ;;  %v1421_v47 = vpack.c.bf16 %v1402_v53, %v1401_v37  ;;  %v1381_v50 = vsel %vm1367_vm2, %v1335_v61, %v1366_v17 }
 0x207   : > { %v1422_v48 = vpack.c.bf16 %v1404_v51, %v1403_v43  ;;  %v1423_v52 = vpack.c.bf16 %v1406_v4, %v1405_v35  ;;  %v1385_v5 = vadd.f32 %v1381_v50, %v1218_v44 }
 0x208   : > { %v1424_v20 = vpack.c.bf16 %v1408_v45, %v1407_v16  ;;  %v1431_v40 = vrot.slane %v1421_v47, 3 }
 0x209   : > { %v1432_v28 = vrot.slane %v1422_v48, 6  ;;  %v1433_v6 = vrot.slane %v1422_v48, 1  ;;  %v1434_v62 = vrot.slane %v1423_v52, 4  ;;  %v1435_v29 = vrot.slane %v1423_v52, 7  ;;  %1391 = vst.msk [vmem:[#allocation2 + $0x8] sm:$0x3] %vm2142_vm6, %v1385_v5 }
 0x20a   : > { %v1436_v63 = vrot.slane %v1424_v20, 2  ;;  %v1437_v2 = vrot.slane %v1424_v20, 5  ;;  %v1441_v3 = vsel %vm1367_vm2, %v1421_v47, %v1431_v40 }
 0x20b   : > { %v1444_v7 = vsel %vm2284_vm3, %v1432_v28, %v1433_v6  ;;  %v1448_v12 = vsel %vm1373_vm5, %v1434_v62, %v1435_v29  ;;  %vm2286_vm5 = vmor %vm2165_vm11, %vm2159_vm10 }
 0x20c   : > { %v1445_v57 = vsel %vm2285_vm1, %v1441_v3, %v1444_v7  ;;  %v1451_v8 = vsel %vm1375_vm9, %v1436_v63, %v1437_v2 }
 0x20d   : > { %v1452_v10 = vsel %vm1377_vm14, %v1448_v12, %v1451_v8 }
 0x20e   : > { %v1453_v0 = vsel %vm1379_vm0, %v1445_v57, %v1452_v10 }
 0x20f   : > { %v1491_v11 = vsel %vm1489_vm8, %v1453_v0, %v1490_v38 }
 0x210   : > { %1492 = vst [vmem:[%s240_s18] sm:$0xff] %v1491_v11  ;;  %v1396_v13 = vld [vmem:[#allocation2 + $0x8] sm:$0x3] }
 0x211   : > { %v1398_v59 = vmul.f32 0.015625, %v1396_v13 }
 0x213   : > { %v1409_v15 = vperm.slane %v1398_v59, 0  ;;  %v1410_v1 = vperm.slane %v1398_v59, 1 }
 0x215   : > { %v1425_v55 = vpack.c.bf16 %v1410_v1, %v1409_v15 }
 0x217   : > { %v1438_v9 = vrot.slane %v1425_v55, 3 }
 0x219   : > { %v1456_v54 = vsel %vm1367_vm2, %v1425_v55, %v1438_v9 }
 0x21a   : > { %v1494_v18 = vsel %vm2286_vm5, %v1456_v54, %v1493_v33 }
 0x21b   : > { %1495 = vst [vmem:[%s240_s18 + $0x8] sm:$0x3] %v1494_v18 }
 0x21c PF: > { %s15_s17 = sadd.s32 1, %s1865_s17   ;;  %s2287_s15 = smov %s1861_s16 }
 0x21d   : > { %p12_p8 = scmp.ge.s32.totalorder %s15_s17, 4   ;;  %s2288_s16 = smov %s2290_s19 }
 0x21f   :  { %14 = sbr.rel (!%p12_p8) target bundleno = 2 (0x2), region = 79 }
 0x224   :  { %1515 = vsyncpa [#allocation4], 1 }
 0x225   :  { %1517 = vsyncpa [#allocation4 + $0x1], 1 }

</bundles_post_ra>
